<compile_context>
chip_gen: v7x
topology: tpu7x:2x2x1
jax: 0.10.0
libtpu: 0.0.40
codegen_flags: <defaults>
</compile_context>

<pallas_src>
import functools

import jax
import jax.numpy as jnp
from jax import lax
from jax.experimental import pallas as pl
from jax.experimental.pallas import tpu as pltpu


# ---------------------------------------------------------------------------
# Per-generation scoped-VMEM budget
# ---------------------------------------------------------------------------
def _vmem_limit_bytes():
    """~75% of physical VMEM (leaves headroom for compiler scratch + pipeline bufs)."""
    try:
        cap = pltpu.get_tpu_info().vmem_capacity_bytes
    except Exception:
        cap = 64 * 1024 * 1024          # conservative fallback
    return int(min(cap * 3 // 4, 96 * 1024 * 1024))


_VMEM_LIMIT = _vmem_limit_bytes()


def _row_tile(rows, target=64):
    """Largest divisor of `rows` that is <= target (strip height for tiled passes)."""
    t = min(rows, target)
    while rows % t:
        t -= 1
    return t


# ---------------------------------------------------------------------------
# In-kernel helpers
# ---------------------------------------------------------------------------
def _zero_border(pad_ref, Hp, Wp, Cin):
    """Zero only the 1-px border of the padded scratch (interior is fully rewritten).

    Done every grid step (not under program_id==0) so it stays correct when the
    batch axis is sharded "parallel" across TensorCores.
    """
    zrow = jnp.zeros((1, Wp + 2, Cin), pad_ref.dtype)
    pad_ref[0:1, :, :] = zrow
    pad_ref[Hp + 1:Hp + 2, :, :] = zrow
    zcol = jnp.zeros((Hp + 2, 1, Cin), pad_ref.dtype)
    pad_ref[:, 0:1, :] = zcol
    pad_ref[:, Wp + 1:Wp + 2, :] = zcol


def _conv3x3(pad_ref, w_ref, Hp, Wp, Cin, Cout):
    """3x3 'same' conv as 9 accumulating MXU matmuls on shifted views (no im2col scratch).

    pad_ref: (Hp+2, Wp+2, Cin) bf16, zero 1-px border.
    w_ref:   (9, Cin, Cout)    bf16, tap-major (dy*3+dx) so w_ref[k] is a free major-dim index.
    The W-shift (dx) load is hoisted out of the dy loop: 3 relayouts instead of 9.
    H-shifts (dy) are slices along the untiled major dim (free); the (Hp,Wp,Cin) ->
    (Hp*Wp,Cin) reshape is layout-preserving whenever Wp % 8 == 0 (true for UNet sizes).
    Returns (Hp*Wp, Cout) float32 pre-BN activations.
    """
    acc = jnp.zeros((Hp * Wp, Cout), jnp.float32)
    for dx in range(3):
        sh = pad_ref[:, dx:dx + Wp, :]                       # (Hp+2, Wp, Cin) bf16
        for dy in range(3):
            tap = sh[dy:dy + Hp].reshape(Hp * Wp, Cin)       # (Hp*Wp, Cin) bf16
            acc = acc + jnp.dot(tap, w_ref[dy * 3 + dx],
                                preferred_element_type=jnp.float32)
    return acc


def _emit_partial_stats(acc, s_ref, ss_ref):
    """Per-batch partial sum / sum-of-squares in f32 (reduced over N in JAX glue)."""
    s_ref[0] = jnp.sum(acc, axis=0, keepdims=True)
    ss_ref[0] = jnp.sum(acc * acc, axis=0, keepdims=True)


# ---------------------------------------------------------------------------
# Kernel 1: 2x2 max-pool + conv3x3 + per-batch BN-stat emission
# ---------------------------------------------------------------------------
def _pool_conv_kernel(x_ref, w_ref, y_ref, s_ref, ss_ref, pad_ref,
                      *, Hp, Wp, Cin, Cout):
    # x_ref: (1, Hp, 2, Wp, 2*Cin) -- pooling phases exposed by a free wrapper reshape.
    r0 = x_ref[0, :, 0, :, :]                                 # (Hp, Wp, 2*Cin) f32
    r1 = x_ref[0, :, 1, :, :]
    rm = jnp.maximum(r0, r1)                                  # H-phase max (f32 VPU)
    pooled = jnp.maximum(rm[:, :, :Cin], rm[:, :, Cin:])      # W-phase max -> (Hp, Wp, Cin)

    _zero_border(pad_ref, Hp, Wp, Cin)
    pad_ref[1:Hp + 1, 1:Wp + 1, :] = pooled.astype(pad_ref.dtype)

    acc = _conv3x3(pad_ref, w_ref, Hp, Wp, Cin, Cout)         # (Hp*Wp, Cout) f32
    y_ref[0] = acc.reshape(Hp, Wp, Cout).astype(y_ref.dtype)
    _emit_partial_stats(acc, s_ref, ss_ref)


# ---------------------------------------------------------------------------
# Kernel 2: BN(affine) + ReLU + conv3x3 + per-batch BN-stat emission
# ---------------------------------------------------------------------------
def _bnrelu_conv_kernel(x_ref, scale_ref, shift_ref, w_ref,
                        y_ref, s_ref, ss_ref, pad_ref,
                        *, Hp, Wp, Cin, Cout):
    a = x_ref[0].astype(jnp.float32) * scale_ref[0] + shift_ref[0]   # BN in f32
    a = jnp.maximum(a, 0.0)                                          # ReLU

    _zero_border(pad_ref, Hp, Wp, Cin)
    pad_ref[1:Hp + 1, 1:Wp + 1, :] = a.astype(pad_ref.dtype)

    acc = _conv3x3(pad_ref, w_ref, Hp, Wp, Cin, Cout)
    y_ref[0] = acc.reshape(Hp, Wp, Cout).astype(y_ref.dtype)
    _emit_partial_stats(acc, s_ref, ss_ref)


# ---------------------------------------------------------------------------
# Kernel 3: final BN(affine) + ReLU (elementwise, spatially tiled)
# ---------------------------------------------------------------------------
def _bnrelu_kernel(x_ref, scale_ref, shift_ref, o_ref):
    a = x_ref[0].astype(jnp.float32) * scale_ref[0] + shift_ref[0]
    o_ref[0] = jnp.maximum(a, 0.0).astype(o_ref.dtype)


# ---------------------------------------------------------------------------
# Wrappers (pallas_call plumbing)
# ---------------------------------------------------------------------------
def _pool_conv(x_nhwc, w):
    N, H, W, Cin = x_nhwc.shape
    Hp, Wp = H // 2, W // 2
    Cout = w.shape[-1]
    x_r = x_nhwc.reshape(N, Hp, 2, Wp, 2 * Cin)        # expose 2x2 pooling phases (free)
    w9 = w.reshape(9, Cin, Cout).astype(jnp.bfloat16)  # tap-major weights, bf16 MXU operand
    kernel = functools.partial(_pool_conv_kernel, Hp=Hp, Wp=Wp, Cin=Cin, Cout=Cout)
    return pl.pallas_call(
        kernel,
        out_shape=(jax.ShapeDtypeStruct((N, Hp, Wp, Cout), jnp.bfloat16),
                   jax.ShapeDtypeStruct((N, 1, Cout), jnp.float32),
                   jax.ShapeDtypeStruct((N, 1, Cout), jnp.float32)),
        grid_spec=pltpu.PrefetchScalarGridSpec(
            num_scalar_prefetch=0, grid=(N,),
            in_specs=[pl.BlockSpec((1, Hp, 2, Wp, 2 * Cin),
                                   lambda n: (n, 0, 0, 0, 0)),
                      pl.BlockSpec((9, Cin, Cout), lambda n: (0, 0, 0))],
            out_specs=(pl.BlockSpec((1, Hp, Wp, Cout), lambda n: (n, 0, 0, 0)),
                       pl.BlockSpec((1, 1, Cout), lambda n: (n, 0, 0)),
                       pl.BlockSpec((1, 1, Cout), lambda n: (n, 0, 0))),
            scratch_shapes=[pltpu.VMEM((Hp + 2, Wp + 2, Cin), jnp.bfloat16)]),
        compiler_params=pltpu.CompilerParams(
            dimension_semantics=("parallel",),
            vmem_limit_bytes=_VMEM_LIMIT),
    )(x_r, w9)


def _bnrelu_conv(x_nhwc, scale, shift, w):
    N, Hp, Wp, Cin = x_nhwc.shape
    Cout = w.shape[-1]
    w9 = w.reshape(9, Cin, Cout).astype(jnp.bfloat16)
    kernel = functools.partial(_bnrelu_conv_kernel, Hp=Hp, Wp=Wp, Cin=Cin, Cout=Cout)
    return pl.pallas_call(
        kernel,
        out_shape=(jax.ShapeDtypeStruct((N, Hp, Wp, Cout), jnp.bfloat16),
                   jax.ShapeDtypeStruct((N, 1, Cout), jnp.float32),
                   jax.ShapeDtypeStruct((N, 1, Cout), jnp.float32)),
        grid_spec=pltpu.PrefetchScalarGridSpec(
            num_scalar_prefetch=0, grid=(N,),
            in_specs=[pl.BlockSpec((1, Hp, Wp, Cin), lambda n: (n, 0, 0, 0)),
                      pl.BlockSpec((1, 1, Cin), lambda n: (0, 0, 0)),
                      pl.BlockSpec((1, 1, Cin), lambda n: (0, 0, 0)),
                      pl.BlockSpec((9, Cin, Cout), lambda n: (0, 0, 0))],
            out_specs=(pl.BlockSpec((1, Hp, Wp, Cout), lambda n: (n, 0, 0, 0)),
                       pl.BlockSpec((1, 1, Cout), lambda n: (n, 0, 0)),
                       pl.BlockSpec((1, 1, Cout), lambda n: (n, 0, 0))),
            scratch_shapes=[pltpu.VMEM((Hp + 2, Wp + 2, Cin), jnp.bfloat16)]),
        compiler_params=pltpu.CompilerParams(
            dimension_semantics=("parallel",),
            vmem_limit_bytes=_VMEM_LIMIT),
    )(x_nhwc, scale, shift, w9)


def _bnrelu(x_nhwc, scale, shift, out_dtype=jnp.float32):
    N, Hp, Wp, C = x_nhwc.shape
    TH = _row_tile(Hp)                                  # spatial tiling: pure mem-bound pass
    return pl.pallas_call(
        _bnrelu_kernel,
        out_shape=jax.ShapeDtypeStruct((N, Hp, Wp, C), out_dtype),
        grid_spec=pltpu.PrefetchScalarGridSpec(
            num_scalar_prefetch=0, grid=(N, Hp // TH),
            in_specs=[pl.BlockSpec((1, TH, Wp, C), lambda n, h: (n, h, 0, 0)),
                      pl.BlockSpec((1, 1, C), lambda n, h: (0, 0, 0)),
                      pl.BlockSpec((1, 1, C), lambda n, h: (0, 0, 0))],
            out_specs=pl.BlockSpec((1, TH, Wp, C), lambda n, h: (n, h, 0, 0))),
        compiler_params=pltpu.CompilerParams(
            dimension_semantics=("parallel", "parallel"),
            vmem_limit_bytes=_VMEM_LIMIT),
    )(x_nhwc, scale, shift)


def _bn_affine(s_nb, ss_nb, count, gamma, beta, eps=1e-5):
    """Reduce per-batch partial stats and fold BN into per-channel (scale, shift)."""
    s = jnp.sum(s_nb, axis=0)                              # (1, C)
    ss = jnp.sum(ss_nb, axis=0)                            # (1, C)
    mean = s / count
    var = jnp.maximum(ss / count - mean * mean, 0.0)       # biased variance
    scale = gamma / jnp.sqrt(var + eps)
    shift = beta - mean * scale
    C = s.shape[-1]
    return scale.reshape(1, 1, C), shift.reshape(1, 1, C)


def down_forward_nhwc(x_nhwc, p):
    """Native NHWC entry point (use this in an NHWC end-to-end network)."""
    N, H, W, _ = x_nhwc.shape
    assert H % 2 == 0 and W % 2 == 0, "MaxPool2d(2) kernel assumes even H, W"
    Hp, Wp = H // 2, W // 2
    count = float(N * Hp * Wp)

    # Conv biases b1/b2 are intentionally not applied: a bias added before
    # batch-statistics BatchNorm is exactly cancelled by the mean subtraction.
    y1, s1, ss1 = _pool_conv(x_nhwc, p['w1'])                    # maxpool + conv1
    sc1, sh1 = _bn_affine(s1, ss1, count, p['g1'], p['be1'])
    y2, s2, ss2 = _bnrelu_conv(y1, sc1, sh1, p['w2'])            # BN1+ReLU+conv2
    sc2, sh2 = _bn_affine(s2, ss2, count, p['g2'], p['be2'])
    return _bnrelu(y2, sc2, sh2)                                 # BN2 + ReLU (tiled)


def down_forward(x_nchw, p):
    """NCHW compatibility wrapper matching the PyTorch module interface."""
    x = jnp.transpose(x_nchw, (0, 2, 3, 1))                # NCHW -> NHWC
    out = down_forward_nhwc(x, p)
    return jnp.transpose(out, (0, 3, 1, 2))                # NHWC -> NCHW


# ---------------------------------------------------------------------------
# Pure-JAX reference (PyTorch semantics, f32 throughout, including the conv bias)
# ---------------------------------------------------------------------------
def down_reference(x_nchw, p, eps=1e-5):
    x = jnp.transpose(x_nchw, (0, 2, 3, 1))
    N, H, W, C = x.shape
    Hp, Wp = H // 2, W // 2
    x = x.reshape(N, Hp, 2, Wp, 2, C).max(axis=(2, 4))     # MaxPool2d(2)

    def conv_bn_relu(x, w, b, g, be):
        y = lax.conv_general_dilated(
            x, w, (1, 1), 'SAME',
            dimension_numbers=('NHWC', 'HWIO', 'NHWC')) + b
        mean = y.mean(axis=(0, 1, 2))
        var = y.var(axis=(0, 1, 2))
        return jnp.maximum((y - mean) / jnp.sqrt(var + eps) * g + be, 0.0)

    x = conv_bn_relu(x, p['w1'], p['b1'], p['g1'], p['be1'])
    x = conv_bn_relu(x, p['w2'], p['b2'], p['g2'], p['be2'])
    return jnp.transpose(x, (0, 3, 1, 2))


# ---------------------------------------------------------------------------
if __name__ == "__main__":
    nin, nout = 4, 8            # Down(nin=4, nout=8); DoubleConv nmid defaults to nout
    N, H, W = 2, 16, 16

    ks = jax.random.split(jax.random.PRNGKey(0), 9)
    params = {
        'w1':  0.2 * jax.random.normal(ks[0], (3, 3, nin, nout), jnp.float32),
        'b1':  0.1 * jax.random.normal(ks[1], (nout,), jnp.float32),
        'g1':  1.0 + 0.1 * jax.random.normal(ks[2], (nout,), jnp.float32),
        'be1': 0.1 * jax.random.normal(ks[3], (nout,), jnp.float32),
        'w2':  0.2 * jax.random.normal(ks[4], (3, 3, nout, nout), jnp.float32),
        'b2':  0.1 * jax.random.normal(ks[5], (nout,), jnp.float32),
        'g2':  1.0 + 0.1 * jax.random.normal(ks[6], (nout,), jnp.float32),
        'be2': 0.1 * jax.random.normal(ks[7], (nout,), jnp.float32),
    }
    x = jax.random.normal(ks[8], (N, nin, H, W), jnp.float32)

    down_jit = jax.jit(down_forward)
    out = jax.block_until_ready(down_jit(x, params))
    ref = jax.block_until_ready(down_reference(x, params))

    assert out.shape == (N, nout, H // 2, W // 2), out.shape
    err = float(jnp.max(jnp.abs(out - ref)))
    # bf16 matmul operands + bf16 intermediates vs f32 reference -> relaxed tolerance.
    assert err < 6e-2, f"max abs err {err}"
    print("KERNEL_OK")
</pallas_src>

<mosaic_0001>
module attributes {stable_mosaic.version = 11 : i64} {
  func.func @_pool_conv_kernel(%arg0: i32, %arg1: memref<1x8x2x8x8xf32, #tpu.memory_space<vmem>>, %arg2: memref<9x4x8xbf16, #tpu.memory_space<vmem>>, %arg3: memref<1x8x8x8xbf16, #tpu.memory_space<vmem>>, %arg4: memref<1x1x8xf32, #tpu.memory_space<vmem>>, %arg5: memref<1x1x8xf32, #tpu.memory_space<vmem>>, %arg6: memref<10x10x4xbf16, #tpu.memory_space<vmem>>) attributes {dimension_semantics = [#tpu.dimension_semantics<parallel>], iteration_bounds = array<i64: 2>, scalar_prefetch = 0 : i64, scratch_operands = 1 : i64, tpu.core_type = #tpu.core_type<tc>, window_params = [{transform_indices = @transform_0, window_bounds = array<i64: 1, 8, 2, 8, 8>}, {pipeline_mode = #tpu.pipeline_mode<synchronous>, transform_indices = @transform_1, window_bounds = array<i64: 9, 4, 8>}, {transform_indices = @transform_2, window_bounds = array<i64: 1, 8, 8, 8>}, {transform_indices = @transform_3, window_bounds = array<i64: 1, 1, 8>}, {transform_indices = @transform_4, window_bounds = array<i64: 1, 1, 8>}]} {
    %c0 = arith.constant 0 : index
    %c0_0 = arith.constant 0 : index
    %c0_1 = arith.constant 0 : index
    %c0_2 = arith.constant 0 : index
    %c0_3 = arith.constant 0 : index
    %0 = vector.load %arg1[%c0, %c0_0, %c0_1, %c0_2, %c0_3] : memref<1x8x2x8x8xf32, #tpu.memory_space<vmem>>, vector<1x8x1x8x8xf32>
    %1 = vector.shape_cast %0 : vector<1x8x1x8x8xf32> to vector<8x8x8xf32>
    %c0_4 = arith.constant 0 : index
    %c0_5 = arith.constant 0 : index
    %c1 = arith.constant 1 : index
    %c0_6 = arith.constant 0 : index
    %c0_7 = arith.constant 0 : index
    %2 = vector.load %arg1[%c0_4, %c0_5, %c1, %c0_6, %c0_7] : memref<1x8x2x8x8xf32, #tpu.memory_space<vmem>>, vector<1x8x1x8x8xf32>
    %3 = vector.shape_cast %2 : vector<1x8x1x8x8xf32> to vector<8x8x8xf32>
    %4 = arith.maximumf %1, %3 : vector<8x8x8xf32>
    %5 = vector.extract_strided_slice %4 {offsets = [0, 0, 0], sizes = [8, 8, 4], strides = [1, 1, 1]} : vector<8x8x8xf32> to vector<8x8x4xf32>
    %6 = vector.extract_strided_slice %4 {offsets = [0, 0, 4], sizes = [8, 8, 4], strides = [1, 1, 1]} : vector<8x8x8xf32> to vector<8x8x4xf32>
    %7 = arith.maximumf %5, %6 : vector<8x8x4xf32>
    %cst = arith.constant 0.000000e+00 : bf16
    %8 = vector.broadcast %cst : bf16 to vector<1x10x4xbf16>
    %c0_8 = arith.constant 0 : index
    %c0_9 = arith.constant 0 : index
    %c0_10 = arith.constant 0 : index
    %9 = vector.load %arg6[%c0_8, %c0_9, %c0_10] : memref<10x10x4xbf16, #tpu.memory_space<vmem>>, vector<1x10x4xbf16>
    tpu.vector_store %arg6[%c0_8, %c0_9, %c0_10], %8 {strides = array<i32>} : memref<10x10x4xbf16, #tpu.memory_space<vmem>>, vector<1x10x4xbf16>,
    %c9 = arith.constant 9 : index
    %c0_11 = arith.constant 0 : index
    %c0_12 = arith.constant 0 : index
    %10 = vector.load %arg6[%c9, %c0_11, %c0_12] : memref<10x10x4xbf16, #tpu.memory_space<vmem>>, vector<1x10x4xbf16>
    tpu.vector_store %arg6[%c9, %c0_11, %c0_12], %8 {strides = array<i32>} : memref<10x10x4xbf16, #tpu.memory_space<vmem>>, vector<1x10x4xbf16>,
    %cst_13 = arith.constant 0.000000e+00 : bf16
    %11 = vector.broadcast %cst_13 : bf16 to vector<10x1x4xbf16>
    %c0_14 = arith.constant 0 : index
    %c0_15 = arith.constant 0 : index
    %c0_16 = arith.constant 0 : index
    %12 = vector.load %arg6[%c0_14, %c0_15, %c0_16] : memref<10x10x4xbf16, #tpu.memory_space<vmem>>, vector<10x1x4xbf16>
    tpu.vector_store %arg6[%c0_14, %c0_15, %c0_16], %11 {strides = array<i32>} : memref<10x10x4xbf16, #tpu.memory_space<vmem>>, vector<10x1x4xbf16>,
    %c0_17 = arith.constant 0 : index
    %c9_18 = arith.constant 9 : index
    %c0_19 = arith.constant 0 : index
    %13 = vector.load %arg6[%c0_17, %c9_18, %c0_19] : memref<10x10x4xbf16, #tpu.memory_space<vmem>>, vector<10x1x4xbf16>
    tpu.vector_store %arg6[%c0_17, %c9_18, %c0_19], %11 {strides = array<i32>} : memref<10x10x4xbf16, #tpu.memory_space<vmem>>, vector<10x1x4xbf16>,
    %14 = arith.truncf %7 : vector<8x8x4xf32> to vector<8x8x4xbf16>
    %c1_20 = arith.constant 1 : index
    %c1_21 = arith.constant 1 : index
    %c0_22 = arith.constant 0 : index
    %15 = vector.load %arg6[%c1_20, %c1_21, %c0_22] : memref<10x10x4xbf16, #tpu.memory_space<vmem>>, vector<8x8x4xbf16>
    tpu.vector_store %arg6[%c1_20, %c1_21, %c0_22], %14 {strides = array<i32>} : memref<10x10x4xbf16, #tpu.memory_space<vmem>>, vector<8x8x4xbf16>,
    %cst_23 = arith.constant 0.000000e+00 : f32
    %16 = vector.broadcast %cst_23 : f32 to vector<64x8xf32>
    %c0_24 = arith.constant 0 : index
    %c0_25 = arith.constant 0 : index
    %c0_26 = arith.constant 0 : index
    %17 = vector.load %arg6[%c0_24, %c0_25, %c0_26] : memref<10x10x4xbf16, #tpu.memory_space<vmem>>, vector<10x8x4xbf16>
    %18 = vector.extract_strided_slice %17 {offsets = [0, 0, 0], sizes = [8, 8, 4], strides = [1, 1, 1]} : vector<10x8x4xbf16> to vector<8x8x4xbf16>
    %19 = vector.shape_cast %18 : vector<8x8x4xbf16> to vector<64x4xbf16>
    %c0_27 = arith.constant 0 : index
    %c0_28 = arith.constant 0 : index
    %c0_29 = arith.constant 0 : index
    %20 = vector.load %arg2[%c0_27, %c0_28, %c0_29] : memref<9x4x8xbf16, #tpu.memory_space<vmem>>, vector<1x4x8xbf16>
    %21 = vector.shape_cast %20 : vector<1x4x8xbf16> to vector<4x8xbf16>
    %cst_30 = arith.constant dense<0.000000e+00> : vector<64x8xf32>
    %22 = tpu.matmul %19, %21, %cst_30 {dimension_numbers = #tpu.dot_dimension_numbers<[1], [0], [0], [1], [0, 0, 1, 1], [], []>} : vector<64x4xbf16>, vector<4x8xbf16>, vector<64x8xf32> -> vector<64x8xf32>
    %23 = arith.addf %16, %22 : vector<64x8xf32>
    %24 = vector.extract_strided_slice %17 {offsets = [1, 0, 0], sizes = [8, 8, 4], strides = [1, 1, 1]} : vector<10x8x4xbf16> to vector<8x8x4xbf16>
    %25 = vector.shape_cast %24 : vector<8x8x4xbf16> to vector<64x4xbf16>
    %c3 = arith.constant 3 : index
    %c0_31 = arith.constant 0 : index
    %c0_32 = arith.constant 0 : index
    %26 = vector.load %arg2[%c3, %c0_31, %c0_32] : memref<9x4x8xbf16, #tpu.memory_space<vmem>>, vector<1x4x8xbf16>
    %27 = vector.shape_cast %26 : vector<1x4x8xbf16> to vector<4x8xbf16>
    %cst_33 = arith.constant dense<0.000000e+00> : vector<64x8xf32>
    %28 = tpu.matmul %25, %27, %cst_33 {dimension_numbers = #tpu.dot_dimension_numbers<[1], [0], [0], [1], [0, 0, 1, 1], [], []>} : vector<64x4xbf16>, vector<4x8xbf16>, vector<64x8xf32> -> vector<64x8xf32>
    %29 = arith.addf %23, %28 : vector<64x8xf32>
    %30 = vector.extract_strided_slice %17 {offsets = [2, 0, 0], sizes = [8, 8, 4], strides = [1, 1, 1]} : vector<10x8x4xbf16> to vector<8x8x4xbf16>
    %31 = vector.shape_cast %30 : vector<8x8x4xbf16> to vector<64x4xbf16>
    %c6 = arith.constant 6 : index
    %c0_34 = arith.constant 0 : index
    %c0_35 = arith.constant 0 : index
    %32 = vector.load %arg2[%c6, %c0_34, %c0_35] : memref<9x4x8xbf16, #tpu.memory_space<vmem>>, vector<1x4x8xbf16>
    %33 = vector.shape_cast %32 : vector<1x4x8xbf16> to vector<4x8xbf16>
    %cst_36 = arith.constant dense<0.000000e+00> : vector<64x8xf32>
    %34 = tpu.matmul %31, %33, %cst_36 {dimension_numbers = #tpu.dot_dimension_numbers<[1], [0], [0], [1], [0, 0, 1, 1], [], []>} : vector<64x4xbf16>, vector<4x8xbf16>, vector<64x8xf32> -> vector<64x8xf32>
    %35 = arith.addf %29, %34 : vector<64x8xf32>
    %c0_37 = arith.constant 0 : index
    %c1_38 = arith.constant 1 : index
    %c0_39 = arith.constant 0 : index
    %36 = vector.load %arg6[%c0_37, %c1_38, %c0_39] : memref<10x10x4xbf16, #tpu.memory_space<vmem>>, vector<10x8x4xbf16>
    %37 = vector.extract_strided_slice %36 {offsets = [0, 0, 0], sizes = [8, 8, 4], strides = [1, 1, 1]} : vector<10x8x4xbf16> to vector<8x8x4xbf16>
    %38 = vector.shape_cast %37 : vector<8x8x4xbf16> to vector<64x4xbf16>
    %c1_40 = arith.constant 1 : index
    %c0_41 = arith.constant 0 : index
    %c0_42 = arith.constant 0 : index
    %39 = vector.load %arg2[%c1_40, %c0_41, %c0_42] : memref<9x4x8xbf16, #tpu.memory_space<vmem>>, vector<1x4x8xbf16>
    %40 = vector.shape_cast %39 : vector<1x4x8xbf16> to vector<4x8xbf16>
    %cst_43 = arith.constant dense<0.000000e+00> : vector<64x8xf32>
    %41 = tpu.matmul %38, %40, %cst_43 {dimension_numbers = #tpu.dot_dimension_numbers<[1], [0], [0], [1], [0, 0, 1, 1], [], []>} : vector<64x4xbf16>, vector<4x8xbf16>, vector<64x8xf32> -> vector<64x8xf32>
    %42 = arith.addf %35, %41 : vector<64x8xf32>
    %43 = vector.extract_strided_slice %36 {offsets = [1, 0, 0], sizes = [8, 8, 4], strides = [1, 1, 1]} : vector<10x8x4xbf16> to vector<8x8x4xbf16>
    %44 = vector.shape_cast %43 : vector<8x8x4xbf16> to vector<64x4xbf16>
    %c4 = arith.constant 4 : index
    %c0_44 = arith.constant 0 : index
    %c0_45 = arith.constant 0 : index
    %45 = vector.load %arg2[%c4, %c0_44, %c0_45] : memref<9x4x8xbf16, #tpu.memory_space<vmem>>, vector<1x4x8xbf16>
    %46 = vector.shape_cast %45 : vector<1x4x8xbf16> to vector<4x8xbf16>
    %cst_46 = arith.constant dense<0.000000e+00> : vector<64x8xf32>
    %47 = tpu.matmul %44, %46, %cst_46 {dimension_numbers = #tpu.dot_dimension_numbers<[1], [0], [0], [1], [0, 0, 1, 1], [], []>} : vector<64x4xbf16>, vector<4x8xbf16>, vector<64x8xf32> -> vector<64x8xf32>
    %48 = arith.addf %42, %47 : vector<64x8xf32>
    %49 = vector.extract_strided_slice %36 {offsets = [2, 0, 0], sizes = [8, 8, 4], strides = [1, 1, 1]} : vector<10x8x4xbf16> to vector<8x8x4xbf16>
    %50 = vector.shape_cast %49 : vector<8x8x4xbf16> to vector<64x4xbf16>
    %c7 = arith.constant 7 : index
    %c0_47 = arith.constant 0 : index
    %c0_48 = arith.constant 0 : index
    %51 = vector.load %arg2[%c7, %c0_47, %c0_48] : memref<9x4x8xbf16, #tpu.memory_space<vmem>>, vector<1x4x8xbf16>
    %52 = vector.shape_cast %51 : vector<1x4x8xbf16> to vector<4x8xbf16>
    %cst_49 = arith.constant dense<0.000000e+00> : vector<64x8xf32>
    %53 = tpu.matmul %50, %52, %cst_49 {dimension_numbers = #tpu.dot_dimension_numbers<[1], [0], [0], [1], [0, 0, 1, 1], [], []>} : vector<64x4xbf16>, vector<4x8xbf16>, vector<64x8xf32> -> vector<64x8xf32>
    %54 = arith.addf %48, %53 : vector<64x8xf32>
    %c0_50 = arith.constant 0 : index
    %c2 = arith.constant 2 : index
    %c0_51 = arith.constant 0 : index
    %55 = vector.load %arg6[%c0_50, %c2, %c0_51] : memref<10x10x4xbf16, #tpu.memory_space<vmem>>, vector<10x8x4xbf16>
    %56 = vector.extract_strided_slice %55 {offsets = [0, 0, 0], sizes = [8, 8, 4], strides = [1, 1, 1]} : vector<10x8x4xbf16> to vector<8x8x4xbf16>
    %57 = vector.shape_cast %56 : vector<8x8x4xbf16> to vector<64x4xbf16>
    %c2_52 = arith.constant 2 : index
    %c0_53 = arith.constant 0 : index
    %c0_54 = arith.constant 0 : index
    %58 = vector.load %arg2[%c2_52, %c0_53, %c0_54] : memref<9x4x8xbf16, #tpu.memory_space<vmem>>, vector<1x4x8xbf16>
    %59 = vector.shape_cast %58 : vector<1x4x8xbf16> to vector<4x8xbf16>
    %cst_55 = arith.constant dense<0.000000e+00> : vector<64x8xf32>
    %60 = tpu.matmul %57, %59, %cst_55 {dimension_numbers = #tpu.dot_dimension_numbers<[1], [0], [0], [1], [0, 0, 1, 1], [], []>} : vector<64x4xbf16>, vector<4x8xbf16>, vector<64x8xf32> -> vector<64x8xf32>
    %61 = arith.addf %54, %60 : vector<64x8xf32>
    %62 = vector.extract_strided_slice %55 {offsets = [1, 0, 0], sizes = [8, 8, 4], strides = [1, 1, 1]} : vector<10x8x4xbf16> to vector<8x8x4xbf16>
    %63 = vector.shape_cast %62 : vector<8x8x4xbf16> to vector<64x4xbf16>
    %c5 = arith.constant 5 : index
    %c0_56 = arith.constant 0 : index
    %c0_57 = arith.constant 0 : index
    %64 = vector.load %arg2[%c5, %c0_56, %c0_57] : memref<9x4x8xbf16, #tpu.memory_space<vmem>>, vector<1x4x8xbf16>
    %65 = vector.shape_cast %64 : vector<1x4x8xbf16> to vector<4x8xbf16>
    %cst_58 = arith.constant dense<0.000000e+00> : vector<64x8xf32>
    %66 = tpu.matmul %63, %65, %cst_58 {dimension_numbers = #tpu.dot_dimension_numbers<[1], [0], [0], [1], [0, 0, 1, 1], [], []>} : vector<64x4xbf16>, vector<4x8xbf16>, vector<64x8xf32> -> vector<64x8xf32>
    %67 = arith.addf %61, %66 : vector<64x8xf32>
    %68 = vector.extract_strided_slice %55 {offsets = [2, 0, 0], sizes = [8, 8, 4], strides = [1, 1, 1]} : vector<10x8x4xbf16> to vector<8x8x4xbf16>
    %69 = vector.shape_cast %68 : vector<8x8x4xbf16> to vector<64x4xbf16>
    %c8 = arith.constant 8 : index
    %c0_59 = arith.constant 0 : index
    %c0_60 = arith.constant 0 : index
    %70 = vector.load %arg2[%c8, %c0_59, %c0_60] : memref<9x4x8xbf16, #tpu.memory_space<vmem>>, vector<1x4x8xbf16>
    %71 = vector.shape_cast %70 : vector<1x4x8xbf16> to vector<4x8xbf16>
    %cst_61 = arith.constant dense<0.000000e+00> : vector<64x8xf32>
    %72 = tpu.matmul %69, %71, %cst_61 {dimension_numbers = #tpu.dot_dimension_numbers<[1], [0], [0], [1], [0, 0, 1, 1], [], []>} : vector<64x4xbf16>, vector<4x8xbf16>, vector<64x8xf32> -> vector<64x8xf32>
    %73 = arith.addf %67, %72 : vector<64x8xf32>
    %74 = vector.shape_cast %73 : vector<64x8xf32> to vector<8x8x8xf32>
    %75 = arith.truncf %74 : vector<8x8x8xf32> to vector<8x8x8xbf16>
    %c0_62 = arith.constant 0 : index
    %c0_63 = arith.constant 0 : index
    %c0_64 = arith.constant 0 : index
    %c0_65 = arith.constant 0 : index
    %76 = vector.load %arg3[%c0_62, %c0_63, %c0_64, %c0_65] : memref<1x8x8x8xbf16, #tpu.memory_space<vmem>>, vector<1x8x8x8xbf16>
    %77 = vector.shape_cast %76 : vector<1x8x8x8xbf16> to vector<8x8x8xbf16>
    %78 = vector.shape_cast %75 : vector<8x8x8xbf16> to vector<1x8x8x8xbf16>
    tpu.vector_store %arg3[%c0_62, %c0_63, %c0_64, %c0_65], %78 {strides = array<i32>} : memref<1x8x8x8xbf16, #tpu.memory_space<vmem>>, vector<1x8x8x8xbf16>,
    %cst_66 = arith.constant dense<0.000000e+00> : vector<8xf32>
    %79 = vector.multi_reduction <add>, %73, %cst_66 [0] : vector<64x8xf32> to vector<8xf32>
    %80 = vector.shape_cast %79 : vector<8xf32> to vector<1x8xf32>
    %c0_67 = arith.constant 0 : index
    %c0_68 = arith.constant 0 : index
    %c0_69 = arith.constant 0 : index
    %81 = vector.load %arg4[%c0_67, %c0_68, %c0_69] : memref<1x1x8xf32, #tpu.memory_space<vmem>>, vector<1x1x8xf32>
    %82 = vector.shape_cast %81 : vector<1x1x8xf32> to vector<1x8xf32>
    %83 = vector.shape_cast %80 : vector<1x8xf32> to vector<1x1x8xf32>
    tpu.vector_store %arg4[%c0_67, %c0_68, %c0_69], %83 {strides = array<i32>} : memref<1x1x8xf32, #tpu.memory_space<vmem>>, vector<1x1x8xf32>,
    %84 = arith.mulf %73, %73 : vector<64x8xf32>
    %cst_70 = arith.constant dense<0.000000e+00> : vector<8xf32>
    %85 = vector.multi_reduction <add>, %84, %cst_70 [0] : vector<64x8xf32> to vector<8xf32>
    %86 = vector.shape_cast %85 : vector<8xf32> to vector<1x8xf32>
    %c0_71 = arith.constant 0 : index
    %c0_72 = arith.constant 0 : index
    %c0_73 = arith.constant 0 : index
    %87 = vector.load %arg5[%c0_71, %c0_72, %c0_73] : memref<1x1x8xf32, #tpu.memory_space<vmem>>, vector<1x1x8xf32>
    %88 = vector.shape_cast %87 : vector<1x1x8xf32> to vector<1x8xf32>
    %89 = vector.shape_cast %86 : vector<1x8xf32> to vector<1x1x8xf32>
    tpu.vector_store %arg5[%c0_71, %c0_72, %c0_73], %89 {strides = array<i32>} : memref<1x1x8xf32, #tpu.memory_space<vmem>>, vector<1x1x8xf32>,
    return
  }
  func.func @transform_0(%arg0: i32) -> (i32, i32, i32, i32, i32) {
    %c0_i32 = arith.constant 0 : i32
    %c0_i32_0 = arith.constant 0 : i32
    %c0_i32_1 = arith.constant 0 : i32
    %c0_i32_2 = arith.constant 0 : i32
    %c0_i32_3 = arith.constant 0 : i32
    return %arg0, %c0_i32, %c0_i32_0, %c0_i32_1, %c0_i32_2 : i32, i32, i32, i32, i32
  }
  func.func @transform_1(%arg0: i32) -> (i32, i32, i32) {
    %c0_i32 = arith.constant 0 : i32
    %c0_i32_0 = arith.constant 0 : i32
    %c0_i32_1 = arith.constant 0 : i32
    %c0_i32_2 = arith.constant 0 : i32
    return %c0_i32, %c0_i32_0, %c0_i32_1 : i32, i32, i32
  }
  func.func @transform_2(%arg0: i32) -> (i32, i32, i32, i32) {
    %c0_i32 = arith.constant 0 : i32
    %c0_i32_0 = arith.constant 0 : i32
    %c0_i32_1 = arith.constant 0 : i32
    %c0_i32_2 = arith.constant 0 : i32
    return %arg0, %c0_i32, %c0_i32_0, %c0_i32_1 : i32, i32, i32, i32
  }
  func.func @transform_3(%arg0: i32) -> (i32, i32, i32) {
    %c0_i32 = arith.constant 0 : i32
    %c0_i32_0 = arith.constant 0 : i32
    %c0_i32_1 = arith.constant 0 : i32
    return %arg0, %c0_i32, %c0_i32_0 : i32, i32, i32
  }
  func.func @transform_4(%arg0: i32) -> (i32, i32, i32) {
    %c0_i32 = arith.constant 0 : i32
    %c0_i32_0 = arith.constant 0 : i32
    %c0_i32_1 = arith.constant 0 : i32
    return %arg0, %c0_i32, %c0_i32_0 : i32, i32, i32
  }
}

module attributes {stable_mosaic.version = 11 : i64} {
  func.func @_bnrelu_kernel(%arg0: i32, %arg1: i32, %arg2: memref<1x8x8x8xbf16, #tpu.memory_space<vmem>>, %arg3: memref<1x1x8xf32, #tpu.memory_space<vmem>>, %arg4: memref<1x1x8xf32, #tpu.memory_space<vmem>>, %arg5: memref<1x8x8x8xf32, #tpu.memory_space<vmem>>) attributes {dimension_semantics = [#tpu.dimension_semantics<parallel>, #tpu.dimension_semantics<parallel>], iteration_bounds = array<i64: 2, 1>, scalar_prefetch = 0 : i64, scratch_operands = 0 : i64, tpu.core_type = #tpu.core_type<tc>, window_params = [{transform_indices = @transform_0, window_bounds = array<i64: 1, 8, 8, 8>}, {pipeline_mode = #tpu.pipeline_mode<synchronous>, transform_indices = @transform_1, window_bounds = array<i64: 1, 1, 8>}, {pipeline_mode = #tpu.pipeline_mode<synchronous>, transform_indices = @transform_2, window_bounds = array<i64: 1, 1, 8>}, {transform_indices = @transform_3, window_bounds = array<i64: 1, 8, 8, 8>}]} {
    %c0 = arith.constant 0 : index
    %c0_0 = arith.constant 0 : index
    %c0_1 = arith.constant 0 : index
    %c0_2 = arith.constant 0 : index
    %0 = vector.load %arg2[%c0, %c0_0, %c0_1, %c0_2] : memref<1x8x8x8xbf16, #tpu.memory_space<vmem>>, vector<1x8x8x8xbf16>
    %1 = vector.shape_cast %0 : vector<1x8x8x8xbf16> to vector<8x8x8xbf16>
    %2 = arith.extf %1 : vector<8x8x8xbf16> to vector<8x8x8xf32>
    %c0_3 = arith.constant 0 : index
    %c0_4 = arith.constant 0 : index
    %c0_5 = arith.constant 0 : index
    %3 = vector.load %arg3[%c0_3, %c0_4, %c0_5] : memref<1x1x8xf32, #tpu.memory_space<vmem>>, vector<1x1x8xf32>
    %4 = vector.shape_cast %3 : vector<1x1x8xf32> to vector<1x8xf32>
    %5 = vector.shape_cast %4 : vector<1x8xf32> to vector<1x1x8xf32>
    %6 = vector.broadcast %5 : vector<1x1x8xf32> to vector<8x8x8xf32>
    %7 = arith.mulf %2, %6 : vector<8x8x8xf32>
    %c0_6 = arith.constant 0 : index
    %c0_7 = arith.constant 0 : index
    %c0_8 = arith.constant 0 : index
    %8 = vector.load %arg4[%c0_6, %c0_7, %c0_8] : memref<1x1x8xf32, #tpu.memory_space<vmem>>, vector<1x1x8xf32>
    %9 = vector.shape_cast %8 : vector<1x1x8xf32> to vector<1x8xf32>
    %10 = vector.shape_cast %9 : vector<1x8xf32> to vector<1x1x8xf32>
    %11 = vector.broadcast %10 : vector<1x1x8xf32> to vector<8x8x8xf32>
    %12 = arith.addf %7, %11 : vector<8x8x8xf32>
    %cst = arith.constant 0.000000e+00 : f32
    %13 = vector.broadcast %cst : f32 to vector<8x8x8xf32>
    %14 = arith.maximumf %12, %13 : vector<8x8x8xf32>
    %c0_9 = arith.constant 0 : index
    %c0_10 = arith.constant 0 : index
    %c0_11 = arith.constant 0 : index
    %c0_12 = arith.constant 0 : index
    %15 = vector.load %arg5[%c0_9, %c0_10, %c0_11, %c0_12] : memref<1x8x8x8xf32, #tpu.memory_space<vmem>>, vector<1x8x8x8xf32>
    %16 = vector.shape_cast %15 : vector<1x8x8x8xf32> to vector<8x8x8xf32>
    %17 = vector.shape_cast %14 : vector<8x8x8xf32> to vector<1x8x8x8xf32>
    tpu.vector_store %arg5[%c0_9, %c0_10, %c0_11, %c0_12], %17 {strides = array<i32>} : memref<1x8x8x8xf32, #tpu.memory_space<vmem>>, vector<1x8x8x8xf32>,
    return
  }
  func.func @transform_0(%arg0: i32, %arg1: i32) -> (i32, i32, i32, i32) {
    %c0_i32 = arith.constant 0 : i32
    %c0_i32_0 = arith.constant 0 : i32
    %c0_i32_1 = arith.constant 0 : i32
    return %arg0, %arg1, %c0_i32, %c0_i32_0 : i32, i32, i32, i32
  }
  func.func @transform_1(%arg0: i32, %arg1: i32) -> (i32, i32, i32) {
    %c0_i32 = arith.constant 0 : i32
    %c0_i32_0 = arith.constant 0 : i32
    %c0_i32_1 = arith.constant 0 : i32
    %c0_i32_2 = arith.constant 0 : i32
    return %c0_i32, %c0_i32_0, %c0_i32_1 : i32, i32, i32
  }
  func.func @transform_2(%arg0: i32, %arg1: i32) -> (i32, i32, i32) {
    %c0_i32 = arith.constant 0 : i32
    %c0_i32_0 = arith.constant 0 : i32
    %c0_i32_1 = arith.constant 0 : i32
    %c0_i32_2 = arith.constant 0 : i32
    return %c0_i32, %c0_i32_0, %c0_i32_1 : i32, i32, i32
  }
  func.func @transform_3(%arg0: i32, %arg1: i32) -> (i32, i32, i32, i32) {
    %c0_i32 = arith.constant 0 : i32
    %c0_i32_0 = arith.constant 0 : i32
    %c0_i32_1 = arith.constant 0 : i32
    return %arg0, %arg1, %c0_i32, %c0_i32_0 : i32, i32, i32, i32
  }
}

module attributes {stable_mosaic.version = 11 : i64} {
  func.func @_bnrelu_conv_kernel(%arg0: i32, %arg1: memref<1x8x8x8xbf16, #tpu.memory_space<vmem>>, %arg2: memref<1x1x8xf32, #tpu.memory_space<vmem>>, %arg3: memref<1x1x8xf32, #tpu.memory_space<vmem>>, %arg4: memref<9x8x8xbf16, #tpu.memory_space<vmem>>, %arg5: memref<1x8x8x8xbf16, #tpu.memory_space<vmem>>, %arg6: memref<1x1x8xf32, #tpu.memory_space<vmem>>, %arg7: memref<1x1x8xf32, #tpu.memory_space<vmem>>, %arg8: memref<10x10x8xbf16, #tpu.memory_space<vmem>>) attributes {dimension_semantics = [#tpu.dimension_semantics<parallel>], iteration_bounds = array<i64: 2>, scalar_prefetch = 0 : i64, scratch_operands = 1 : i64, tpu.core_type = #tpu.core_type<tc>, window_params = [{transform_indices = @transform_0, window_bounds = array<i64: 1, 8, 8, 8>}, {pipeline_mode = #tpu.pipeline_mode<synchronous>, transform_indices = @transform_1, window_bounds = array<i64: 1, 1, 8>}, {pipeline_mode = #tpu.pipeline_mode<synchronous>, transform_indices = @transform_2, window_bounds = array<i64: 1, 1, 8>}, {pipeline_mode = #tpu.pipeline_mode<synchronous>, transform_indices = @transform_3, window_bounds = array<i64: 9, 8, 8>}, {transform_indices = @transform_4, window_bounds = array<i64: 1, 8, 8, 8>}, {transform_indices = @transform_5, window_bounds = array<i64: 1, 1, 8>}, {transform_indices = @transform_6, window_bounds = array<i64: 1, 1, 8>}]} {
    %c0 = arith.constant 0 : index
    %c0_0 = arith.constant 0 : index
    %c0_1 = arith.constant 0 : index
    %c0_2 = arith.constant 0 : index
    %0 = vector.load %arg1[%c0, %c0_0, %c0_1, %c0_2] : memref<1x8x8x8xbf16, #tpu.memory_space<vmem>>, vector<1x8x8x8xbf16>
    %1 = vector.shape_cast %0 : vector<1x8x8x8xbf16> to vector<8x8x8xbf16>
    %2 = arith.extf %1 : vector<8x8x8xbf16> to vector<8x8x8xf32>
    %c0_3 = arith.constant 0 : index
    %c0_4 = arith.constant 0 : index
    %c0_5 = arith.constant 0 : index
    %3 = vector.load %arg2[%c0_3, %c0_4, %c0_5] : memref<1x1x8xf32, #tpu.memory_space<vmem>>, vector<1x1x8xf32>
    %4 = vector.shape_cast %3 : vector<1x1x8xf32> to vector<1x8xf32>
    %5 = vector.shape_cast %4 : vector<1x8xf32> to vector<1x1x8xf32>
    %6 = vector.broadcast %5 : vector<1x1x8xf32> to vector<8x8x8xf32>
    %7 = arith.mulf %2, %6 : vector<8x8x8xf32>
    %c0_6 = arith.constant 0 : index
    %c0_7 = arith.constant 0 : index
    %c0_8 = arith.constant 0 : index
    %8 = vector.load %arg3[%c0_6, %c0_7, %c0_8] : memref<1x1x8xf32, #tpu.memory_space<vmem>>, vector<1x1x8xf32>
    %9 = vector.shape_cast %8 : vector<1x1x8xf32> to vector<1x8xf32>
    %10 = vector.shape_cast %9 : vector<1x8xf32> to vector<1x1x8xf32>
    %11 = vector.broadcast %10 : vector<1x1x8xf32> to vector<8x8x8xf32>
    %12 = arith.addf %7, %11 : vector<8x8x8xf32>
    %cst = arith.constant 0.000000e+00 : f32
    %13 = vector.broadcast %cst : f32 to vector<8x8x8xf32>
    %14 = arith.maximumf %12, %13 : vector<8x8x8xf32>
    %cst_9 = arith.constant 0.000000e+00 : bf16
    %15 = vector.broadcast %cst_9 : bf16 to vector<1x10x8xbf16>
    %c0_10 = arith.constant 0 : index
    %c0_11 = arith.constant 0 : index
    %c0_12 = arith.constant 0 : index
    %16 = vector.load %arg8[%c0_10, %c0_11, %c0_12] : memref<10x10x8xbf16, #tpu.memory_space<vmem>>, vector<1x10x8xbf16>
    tpu.vector_store %arg8[%c0_10, %c0_11, %c0_12], %15 {strides = array<i32>} : memref<10x10x8xbf16, #tpu.memory_space<vmem>>, vector<1x10x8xbf16>,
    %c9 = arith.constant 9 : index
    %c0_13 = arith.constant 0 : index
    %c0_14 = arith.constant 0 : index
    %17 = vector.load %arg8[%c9, %c0_13, %c0_14] : memref<10x10x8xbf16, #tpu.memory_space<vmem>>, vector<1x10x8xbf16>
    tpu.vector_store %arg8[%c9, %c0_13, %c0_14], %15 {strides = array<i32>} : memref<10x10x8xbf16, #tpu.memory_space<vmem>>, vector<1x10x8xbf16>,
    %cst_15 = arith.constant 0.000000e+00 : bf16
    %18 = vector.broadcast %cst_15 : bf16 to vector<10x1x8xbf16>
    %c0_16 = arith.constant 0 : index
    %c0_17 = arith.constant 0 : index
    %c0_18 = arith.constant 0 : index
    %19 = vector.load %arg8[%c0_16, %c0_17, %c0_18] : memref<10x10x8xbf16, #tpu.memory_space<vmem>>, vector<10x1x8xbf16>
    tpu.vector_store %arg8[%c0_16, %c0_17, %c0_18], %18 {strides = array<i32>} : memref<10x10x8xbf16, #tpu.memory_space<vmem>>, vector<10x1x8xbf16>,
    %c0_19 = arith.constant 0 : index
    %c9_20 = arith.constant 9 : index
    %c0_21 = arith.constant 0 : index
    %20 = vector.load %arg8[%c0_19, %c9_20, %c0_21] : memref<10x10x8xbf16, #tpu.memory_space<vmem>>, vector<10x1x8xbf16>
    tpu.vector_store %arg8[%c0_19, %c9_20, %c0_21], %18 {strides = array<i32>} : memref<10x10x8xbf16, #tpu.memory_space<vmem>>, vector<10x1x8xbf16>,
    %21 = arith.truncf %14 : vector<8x8x8xf32> to vector<8x8x8xbf16>
    %c1 = arith.constant 1 : index
    %c1_22 = arith.constant 1 : index
    %c0_23 = arith.constant 0 : index
    %22 = vector.load %arg8[%c1, %c1_22, %c0_23] : memref<10x10x8xbf16, #tpu.memory_space<vmem>>, vector<8x8x8xbf16>
    tpu.vector_store %arg8[%c1, %c1_22, %c0_23], %21 {strides = array<i32>} : memref<10x10x8xbf16, #tpu.memory_space<vmem>>, vector<8x8x8xbf16>,
    %cst_24 = arith.constant 0.000000e+00 : f32
    %23 = vector.broadcast %cst_24 : f32 to vector<64x8xf32>
    %c0_25 = arith.constant 0 : index
    %c0_26 = arith.constant 0 : index
    %c0_27 = arith.constant 0 : index
    %24 = vector.load %arg8[%c0_25, %c0_26, %c0_27] : memref<10x10x8xbf16, #tpu.memory_space<vmem>>, vector<10x8x8xbf16>
    %25 = vector.extract_strided_slice %24 {offsets = [0, 0, 0], sizes = [8, 8, 8], strides = [1, 1, 1]} : vector<10x8x8xbf16> to vector<8x8x8xbf16>
    %26 = vector.shape_cast %25 : vector<8x8x8xbf16> to vector<64x8xbf16>
    %c0_28 = arith.constant 0 : index
    %c0_29 = arith.constant 0 : index
    %c0_30 = arith.constant 0 : index
    %27 = vector.load %arg4[%c0_28, %c0_29, %c0_30] : memref<9x8x8xbf16, #tpu.memory_space<vmem>>, vector<1x8x8xbf16>
    %28 = vector.shape_cast %27 : vector<1x8x8xbf16> to vector<8x8xbf16>
    %cst_31 = arith.constant dense<0.000000e+00> : vector<64x8xf32>
    %29 = tpu.matmul %26, %28, %cst_31 {dimension_numbers = #tpu.dot_dimension_numbers<[1], [0], [0], [1], [0, 0, 1, 1], [], []>} : vector<64x8xbf16>, vector<8x8xbf16>, vector<64x8xf32> -> vector<64x8xf32>
    %30 = arith.addf %23, %29 : vector<64x8xf32>
    %31 = vector.extract_strided_slice %24 {offsets = [1, 0, 0], sizes = [8, 8, 8], strides = [1, 1, 1]} : vector<10x8x8xbf16> to vector<8x8x8xbf16>
    %32 = vector.shape_cast %31 : vector<8x8x8xbf16> to vector<64x8xbf16>
    %c3 = arith.constant 3 : index
    %c0_32 = arith.constant 0 : index
    %c0_33 = arith.constant 0 : index
    %33 = vector.load %arg4[%c3, %c0_32, %c0_33] : memref<9x8x8xbf16, #tpu.memory_space<vmem>>, vector<1x8x8xbf16>
    %34 = vector.shape_cast %33 : vector<1x8x8xbf16> to vector<8x8xbf16>
    %cst_34 = arith.constant dense<0.000000e+00> : vector<64x8xf32>
    %35 = tpu.matmul %32, %34, %cst_34 {dimension_numbers = #tpu.dot_dimension_numbers<[1], [0], [0], [1], [0, 0, 1, 1], [], []>} : vector<64x8xbf16>, vector<8x8xbf16>, vector<64x8xf32> -> vector<64x8xf32>
    %36 = arith.addf %30, %35 : vector<64x8xf32>
    %37 = vector.extract_strided_slice %24 {offsets = [2, 0, 0], sizes = [8, 8, 8], strides = [1, 1, 1]} : vector<10x8x8xbf16> to vector<8x8x8xbf16>
    %38 = vector.shape_cast %37 : vector<8x8x8xbf16> to vector<64x8xbf16>
    %c6 = arith.constant 6 : index
    %c0_35 = arith.constant 0 : index
    %c0_36 = arith.constant 0 : index
    %39 = vector.load %arg4[%c6, %c0_35, %c0_36] : memref<9x8x8xbf16, #tpu.memory_space<vmem>>, vector<1x8x8xbf16>
    %40 = vector.shape_cast %39 : vector<1x8x8xbf16> to vector<8x8xbf16>
    %cst_37 = arith.constant dense<0.000000e+00> : vector<64x8xf32>
    %41 = tpu.matmul %38, %40, %cst_37 {dimension_numbers = #tpu.dot_dimension_numbers<[1], [0], [0], [1], [0, 0, 1, 1], [], []>} : vector<64x8xbf16>, vector<8x8xbf16>, vector<64x8xf32> -> vector<64x8xf32>
    %42 = arith.addf %36, %41 : vector<64x8xf32>
    %c0_38 = arith.constant 0 : index
    %c1_39 = arith.constant 1 : index
    %c0_40 = arith.constant 0 : index
    %43 = vector.load %arg8[%c0_38, %c1_39, %c0_40] : memref<10x10x8xbf16, #tpu.memory_space<vmem>>, vector<10x8x8xbf16>
    %44 = vector.extract_strided_slice %43 {offsets = [0, 0, 0], sizes = [8, 8, 8], strides = [1, 1, 1]} : vector<10x8x8xbf16> to vector<8x8x8xbf16>
    %45 = vector.shape_cast %44 : vector<8x8x8xbf16> to vector<64x8xbf16>
    %c1_41 = arith.constant 1 : index
    %c0_42 = arith.constant 0 : index
    %c0_43 = arith.constant 0 : index
    %46 = vector.load %arg4[%c1_41, %c0_42, %c0_43] : memref<9x8x8xbf16, #tpu.memory_space<vmem>>, vector<1x8x8xbf16>
    %47 = vector.shape_cast %46 : vector<1x8x8xbf16> to vector<8x8xbf16>
    %cst_44 = arith.constant dense<0.000000e+00> : vector<64x8xf32>
    %48 = tpu.matmul %45, %47, %cst_44 {dimension_numbers = #tpu.dot_dimension_numbers<[1], [0], [0], [1], [0, 0, 1, 1], [], []>} : vector<64x8xbf16>, vector<8x8xbf16>, vector<64x8xf32> -> vector<64x8xf32>
    %49 = arith.addf %42, %48 : vector<64x8xf32>
    %50 = vector.extract_strided_slice %43 {offsets = [1, 0, 0], sizes = [8, 8, 8], strides = [1, 1, 1]} : vector<10x8x8xbf16> to vector<8x8x8xbf16>
    %51 = vector.shape_cast %50 : vector<8x8x8xbf16> to vector<64x8xbf16>
    %c4 = arith.constant 4 : index
    %c0_45 = arith.constant 0 : index
    %c0_46 = arith.constant 0 : index
    %52 = vector.load %arg4[%c4, %c0_45, %c0_46] : memref<9x8x8xbf16, #tpu.memory_space<vmem>>, vector<1x8x8xbf16>
    %53 = vector.shape_cast %52 : vector<1x8x8xbf16> to vector<8x8xbf16>
    %cst_47 = arith.constant dense<0.000000e+00> : vector<64x8xf32>
    %54 = tpu.matmul %51, %53, %cst_47 {dimension_numbers = #tpu.dot_dimension_numbers<[1], [0], [0], [1], [0, 0, 1, 1], [], []>} : vector<64x8xbf16>, vector<8x8xbf16>, vector<64x8xf32> -> vector<64x8xf32>
    %55 = arith.addf %49, %54 : vector<64x8xf32>
    %56 = vector.extract_strided_slice %43 {offsets = [2, 0, 0], sizes = [8, 8, 8], strides = [1, 1, 1]} : vector<10x8x8xbf16> to vector<8x8x8xbf16>
    %57 = vector.shape_cast %56 : vector<8x8x8xbf16> to vector<64x8xbf16>
    %c7 = arith.constant 7 : index
    %c0_48 = arith.constant 0 : index
    %c0_49 = arith.constant 0 : index
    %58 = vector.load %arg4[%c7, %c0_48, %c0_49] : memref<9x8x8xbf16, #tpu.memory_space<vmem>>, vector<1x8x8xbf16>
    %59 = vector.shape_cast %58 : vector<1x8x8xbf16> to vector<8x8xbf16>
    %cst_50 = arith.constant dense<0.000000e+00> : vector<64x8xf32>
    %60 = tpu.matmul %57, %59, %cst_50 {dimension_numbers = #tpu.dot_dimension_numbers<[1], [0], [0], [1], [0, 0, 1, 1], [], []>} : vector<64x8xbf16>, vector<8x8xbf16>, vector<64x8xf32> -> vector<64x8xf32>
    %61 = arith.addf %55, %60 : vector<64x8xf32>
    %c0_51 = arith.constant 0 : index
    %c2 = arith.constant 2 : index
    %c0_52 = arith.constant 0 : index
    %62 = vector.load %arg8[%c0_51, %c2, %c0_52] : memref<10x10x8xbf16, #tpu.memory_space<vmem>>, vector<10x8x8xbf16>
    %63 = vector.extract_strided_slice %62 {offsets = [0, 0, 0], sizes = [8, 8, 8], strides = [1, 1, 1]} : vector<10x8x8xbf16> to vector<8x8x8xbf16>
    %64 = vector.shape_cast %63 : vector<8x8x8xbf16> to vector<64x8xbf16>
    %c2_53 = arith.constant 2 : index
    %c0_54 = arith.constant 0 : index
    %c0_55 = arith.constant 0 : index
    %65 = vector.load %arg4[%c2_53, %c0_54, %c0_55] : memref<9x8x8xbf16, #tpu.memory_space<vmem>>, vector<1x8x8xbf16>
    %66 = vector.shape_cast %65 : vector<1x8x8xbf16> to vector<8x8xbf16>
    %cst_56 = arith.constant dense<0.000000e+00> : vector<64x8xf32>
    %67 = tpu.matmul %64, %66, %cst_56 {dimension_numbers = #tpu.dot_dimension_numbers<[1], [0], [0], [1], [0, 0, 1, 1], [], []>} : vector<64x8xbf16>, vector<8x8xbf16>, vector<64x8xf32> -> vector<64x8xf32>
    %68 = arith.addf %61, %67 : vector<64x8xf32>
    %69 = vector.extract_strided_slice %62 {offsets = [1, 0, 0], sizes = [8, 8, 8], strides = [1, 1, 1]} : vector<10x8x8xbf16> to vector<8x8x8xbf16>
    %70 = vector.shape_cast %69 : vector<8x8x8xbf16> to vector<64x8xbf16>
    %c5 = arith.constant 5 : index
    %c0_57 = arith.constant 0 : index
    %c0_58 = arith.constant 0 : index
    %71 = vector.load %arg4[%c5, %c0_57, %c0_58] : memref<9x8x8xbf16, #tpu.memory_space<vmem>>, vector<1x8x8xbf16>
    %72 = vector.shape_cast %71 : vector<1x8x8xbf16> to vector<8x8xbf16>
    %cst_59 = arith.constant dense<0.000000e+00> : vector<64x8xf32>
    %73 = tpu.matmul %70, %72, %cst_59 {dimension_numbers = #tpu.dot_dimension_numbers<[1], [0], [0], [1], [0, 0, 1, 1], [], []>} : vector<64x8xbf16>, vector<8x8xbf16>, vector<64x8xf32> -> vector<64x8xf32>
    %74 = arith.addf %68, %73 : vector<64x8xf32>
    %75 = vector.extract_strided_slice %62 {offsets = [2, 0, 0], sizes = [8, 8, 8], strides = [1, 1, 1]} : vector<10x8x8xbf16> to vector<8x8x8xbf16>
    %76 = vector.shape_cast %75 : vector<8x8x8xbf16> to vector<64x8xbf16>
    %c8 = arith.constant 8 : index
    %c0_60 = arith.constant 0 : index
    %c0_61 = arith.constant 0 : index
    %77 = vector.load %arg4[%c8, %c0_60, %c0_61] : memref<9x8x8xbf16, #tpu.memory_space<vmem>>, vector<1x8x8xbf16>
    %78 = vector.shape_cast %77 : vector<1x8x8xbf16> to vector<8x8xbf16>
    %cst_62 = arith.constant dense<0.000000e+00> : vector<64x8xf32>
    %79 = tpu.matmul %76, %78, %cst_62 {dimension_numbers = #tpu.dot_dimension_numbers<[1], [0], [0], [1], [0, 0, 1, 1], [], []>} : vector<64x8xbf16>, vector<8x8xbf16>, vector<64x8xf32> -> vector<64x8xf32>
    %80 = arith.addf %74, %79 : vector<64x8xf32>
    %81 = vector.shape_cast %80 : vector<64x8xf32> to vector<8x8x8xf32>
    %82 = arith.truncf %81 : vector<8x8x8xf32> to vector<8x8x8xbf16>
    %c0_63 = arith.constant 0 : index
    %c0_64 = arith.constant 0 : index
    %c0_65 = arith.constant 0 : index
    %c0_66 = arith.constant 0 : index
    %83 = vector.load %arg5[%c0_63, %c0_64, %c0_65, %c0_66] : memref<1x8x8x8xbf16, #tpu.memory_space<vmem>>, vector<1x8x8x8xbf16>
    %84 = vector.shape_cast %83 : vector<1x8x8x8xbf16> to vector<8x8x8xbf16>
    %85 = vector.shape_cast %82 : vector<8x8x8xbf16> to vector<1x8x8x8xbf16>
    tpu.vector_store %arg5[%c0_63, %c0_64, %c0_65, %c0_66], %85 {strides = array<i32>} : memref<1x8x8x8xbf16, #tpu.memory_space<vmem>>, vector<1x8x8x8xbf16>,
    %cst_67 = arith.constant dense<0.000000e+00> : vector<8xf32>
    %86 = vector.multi_reduction <add>, %80, %cst_67 [0] : vector<64x8xf32> to vector<8xf32>
    %87 = vector.shape_cast %86 : vector<8xf32> to vector<1x8xf32>
    %c0_68 = arith.constant 0 : index
    %c0_69 = arith.constant 0 : index
    %c0_70 = arith.constant 0 : index
    %88 = vector.load %arg6[%c0_68, %c0_69, %c0_70] : memref<1x1x8xf32, #tpu.memory_space<vmem>>, vector<1x1x8xf32>
    %89 = vector.shape_cast %88 : vector<1x1x8xf32> to vector<1x8xf32>
    %90 = vector.shape_cast %87 : vector<1x8xf32> to vector<1x1x8xf32>
    tpu.vector_store %arg6[%c0_68, %c0_69, %c0_70], %90 {strides = array<i32>} : memref<1x1x8xf32, #tpu.memory_space<vmem>>, vector<1x1x8xf32>,
    %91 = arith.mulf %80, %80 : vector<64x8xf32>
    %cst_71 = arith.constant dense<0.000000e+00> : vector<8xf32>
    %92 = vector.multi_reduction <add>, %91, %cst_71 [0] : vector<64x8xf32> to vector<8xf32>
    %93 = vector.shape_cast %92 : vector<8xf32> to vector<1x8xf32>
    %c0_72 = arith.constant 0 : index
    %c0_73 = arith.constant 0 : index
    %c0_74 = arith.constant 0 : index
    %94 = vector.load %arg7[%c0_72, %c0_73, %c0_74] : memref<1x1x8xf32, #tpu.memory_space<vmem>>, vector<1x1x8xf32>
    %95 = vector.shape_cast %94 : vector<1x1x8xf32> to vector<1x8xf32>
    %96 = vector.shape_cast %93 : vector<1x8xf32> to vector<1x1x8xf32>
    tpu.vector_store %arg7[%c0_72, %c0_73, %c0_74], %96 {strides = array<i32>} : memref<1x1x8xf32, #tpu.memory_space<vmem>>, vector<1x1x8xf32>,
    return
  }
  func.func @transform_0(%arg0: i32) -> (i32, i32, i32, i32) {
    %c0_i32 = arith.constant 0 : i32
    %c0_i32_0 = arith.constant 0 : i32
    %c0_i32_1 = arith.constant 0 : i32
    %c0_i32_2 = arith.constant 0 : i32
    return %arg0, %c0_i32, %c0_i32_0, %c0_i32_1 : i32, i32, i32, i32
  }
  func.func @transform_1(%arg0: i32) -> (i32, i32, i32) {
    %c0_i32 = arith.constant 0 : i32
    %c0_i32_0 = arith.constant 0 : i32
    %c0_i32_1 = arith.constant 0 : i32
    %c0_i32_2 = arith.constant 0 : i32
    return %c0_i32, %c0_i32_0, %c0_i32_1 : i32, i32, i32
  }
  func.func @transform_2(%arg0: i32) -> (i32, i32, i32) {
    %c0_i32 = arith.constant 0 : i32
    %c0_i32_0 = arith.constant 0 : i32
    %c0_i32_1 = arith.constant 0 : i32
    %c0_i32_2 = arith.constant 0 : i32
    return %c0_i32, %c0_i32_0, %c0_i32_1 : i32, i32, i32
  }
  func.func @transform_3(%arg0: i32) -> (i32, i32, i32) {
    %c0_i32 = arith.constant 0 : i32
    %c0_i32_0 = arith.constant 0 : i32
    %c0_i32_1 = arith.constant 0 : i32
    %c0_i32_2 = arith.constant 0 : i32
    return %c0_i32, %c0_i32_0, %c0_i32_1 : i32, i32, i32
  }
  func.func @transform_4(%arg0: i32) -> (i32, i32, i32, i32) {
    %c0_i32 = arith.constant 0 : i32
    %c0_i32_0 = arith.constant 0 : i32
    %c0_i32_1 = arith.constant 0 : i32
    %c0_i32_2 = arith.constant 0 : i32
    return %arg0, %c0_i32, %c0_i32_0, %c0_i32_1 : i32, i32, i32, i32
  }
  func.func @transform_5(%arg0: i32) -> (i32, i32, i32) {
    %c0_i32 = arith.constant 0 : i32
    %c0_i32_0 = arith.constant 0 : i32
    %c0_i32_1 = arith.constant 0 : i32
    return %arg0, %c0_i32, %c0_i32_0 : i32, i32, i32
  }
  func.func @transform_6(%arg0: i32) -> (i32, i32, i32) {
    %c0_i32 = arith.constant 0 : i32
    %c0_i32_0 = arith.constant 0 : i32
    %c0_i32_1 = arith.constant 0 : i32
    return %arg0, %c0_i32, %c0_i32_0 : i32, i32, i32
  }
}

</mosaic_0001>

<bundles_post_ra>
// kernel: down_forward.5
= control target key start
LH: loop header
LB: loop body
LE: loop exit
PB: predicated region body
PF: predicated region fallthrough
CT: control target
= control target key end

     0   :  { %s462_s12 = smov 0   ;;  %s464_s13 = smov 0   ;;  %s513_s0 = inlined_call_operand.vmem [shape: bf16[2,8,8,8], index: 0, kind: input, shape index: {}]   ;;  %s514_s1 = inlined_call_operand.vmem [shape: f32[1,1,8], index: 1, kind: input, shape index: {}]   ;;  %s515_s2 = inlined_call_operand.vmem [shape: f32[1,1,8], index: 2, kind: input, shape index: {}]   ;;  %s516_s3 = inlined_call_operand.vmem [shape: f32[2,8,8,8], index: 3, kind: output, shape index: {}]  }
   0x1   :  { %s466_s14 = smov 0  }
   0x2 LB: > { %s25_s15 = sadd.s32 1, %s436_s13  ;;  %p364_p0 = scmp.ge.s32.totalorder %s440_s14, 1  ;;  %s440_s14 = sphi %s466_s14, %s13_s14   ;;  %s436_s13 = sphi %s464_s13, %s518_s13   ;;  %s432_s12 = sphi %s462_s12, %s517_s12  }
   0x3   : > { %p27_p1 = scmp.ge.s32.totalorder %s25_s15, 2  ;;  %p158_p2 = scmp.lt.s32.totalorder %s440_s14, 3 }
   0x5   : > { %s520_s15 = smov (%p27_p1, %s25_s15), 0  ;;  %p159_p3 = pnand %p364_p0, %p158_p2 }
   0x6   : > { %p191_p4 = scmp.lt.s32.totalorder (!%p159_p3), %s432_s12, 1  ;;  %v369_v0 = vld [vmem:[%s514_s1] ss:$0 sm:$0xff] (!%p159_p3)  ;;  %vm264_vm0 = vcmask (!%p159_p3), 64512  }
   0x7   : > { %162 = sbr.rel (%p159_p3) target bundleno = 30 (0x1e), region = 32  ;;  %v370_v9 = vld [vmem:[%s515_s2] ss:$0 sm:$0xff] (!%p159_p3) }
   0xe   : > { %s522_s12 = smov (!%p191_p4, %s432_s12), 1 }
   0xf   : > { %s373_s16 = sshll.u32 %s522_s12, 5  ;;  %s374_s24 = sshll.u32 %s522_s12, 6 }
  0x10   : > { %s198_s19 = scalar_lea.vmem %s513_s0, %s373_s16  ;;  %s208_s27 = scalar_lea.vmem %s516_s3, %s374_s24 }
  0x11   : > { %v376_v1 = vld [vmem:[%s198_s19] sm:$0xff]   ;;  %v391_v2 = vld [vmem:[%s198_s19 + $0x8] sm:$0xff]   ;;  %v392_v3 = vld [vmem:[%s198_s19 + $0x10] sm:$0xff]  }
  0x12   : > { %v377_v4 = vunpack.c.l.bf16 %v376_v1  ;;  %v378_v5 = vunpack.c.h.bf16 %v376_v1  ;;  %v381_v6 = vunpack.c.l.bf16 %v391_v2  ;;  %v382_v7 = vunpack.c.h.bf16 %v391_v2  ;;  %v393_v8 = vld [vmem:[%s198_s19 + $0x18] sm:$0xff]  }
  0x13   : > { %v385_v10 = vunpack.c.l.bf16 %v392_v3  ;;  %v386_v11 = vunpack.c.h.bf16 %v392_v3  ;;  %v389_v12 = vunpack.c.l.bf16 %v393_v8  ;;  %v390_v13 = vunpack.c.h.bf16 %v393_v8 }
  0x14   : > { %v233_v14 = vmul.f32 %v377_v4, %v369_v0  ;;  %v234_v15 = vmul.f32 %v378_v5, %v369_v0  ;;  %v235_v16 = vmul.f32 %v381_v6, %v369_v0  ;;  %v236_v17 = vmul.f32 %v382_v7, %v369_v0 }
  0x15   : > { %v237_v18 = vmul.f32 %v385_v10, %v369_v0  ;;  %v238_v19 = vmul.f32 %v386_v11, %v369_v0  ;;  %v239_v20 = vmul.f32 %v389_v12, %v369_v0  ;;  %v240_v21 = vmul.f32 %v390_v13, %v369_v0 }
  0x16   : > { %v248_v22 = vadd.f32 %v370_v9, %v233_v14  ;;  %v249_v23 = vadd.f32 %v370_v9, %v234_v15  ;;  %v250_v24 = vadd.f32 %v370_v9, %v235_v16  ;;  %v251_v25 = vadd.f32 %v370_v9, %v236_v17 }
  0x17   : > { %v252_v26 = vadd.f32 %v370_v9, %v237_v18  ;;  %v253_v27 = vadd.f32 %v370_v9, %v238_v19  ;;  %v254_v28 = vadd.f32 %v370_v9, %v239_v20  ;;  %v255_v29 = vadd.f32 %v370_v9, %v240_v21 }
  0x18   : > { %v256_v30 = vmax.f32 %v248_v22, 0.0  ;;  %v257_v31 = vmax.f32 %v249_v23, 0.0  ;;  %v258_v32 = vmax.f32 %v250_v24, 0.0  ;;  %v259_v33 = vmax.f32 %v251_v25, 0.0 }
  0x19   : > { %v260_v34 = vmax.f32 %v252_v26, 0.0  ;;  %v261_v35 = vmax.f32 %v253_v27, 0.0  ;;  %v262_v36 = vmax.f32 %v254_v28, 0.0  ;;  %v263_v37 = vmax.f32 %v255_v29, 0.0 }
  0x1a   : > { %265 = vst.msk [vmem:[%s208_s27] sm:$0xff] %vm264_vm0, %v256_v30  ;;  %266 = vst.msk [vmem:[%s208_s27 + $0x8] sm:$0xff] %vm264_vm0, %v257_v31 }
  0x1b   : > { %267 = vst.msk [vmem:[%s208_s27 + $0x10] sm:$0xff] %vm264_vm0, %v258_v32  ;;  %268 = vst.msk [vmem:[%s208_s27 + $0x18] sm:$0xff] %vm264_vm0, %v259_v33 }
  0x1c   : > { %269 = vst.msk [vmem:[%s208_s27 + $0x20] sm:$0xff] %vm264_vm0, %v260_v34  ;;  %270 = vst.msk [vmem:[%s208_s27 + $0x28] sm:$0xff] %vm264_vm0, %v261_v35 }
  0x1d   : > { %271 = vst.msk [vmem:[%s208_s27 + $0x30] sm:$0xff] %vm264_vm0, %v262_v36  ;;  %272 = vst.msk [vmem:[%s208_s27 + $0x38] sm:$0xff] %vm264_vm0, %v263_v37 }
  0x1e PF: > { %s13_s14 = sadd.s32 1, %s440_s14   ;;  %s517_s12 = smov %s436_s13 }
  0x1f   : > { %p10_p5 = scmp.ge.s32.totalorder %s13_s14, 4   ;;  %s518_s13 = smov %s520_s15 }
  0x21   :  { %12 = sbr.rel (!%p10_p5) target bundleno = 2 (0x2), region = 62 }

// kernel: down_forward.3
= control target key start
LH: loop header
LB: loop body
LE: loop exit
PB: predicated region body
PF: predicated region fallthrough
CT: control target
= control target key end

     0   :  { %s2176_s15 = smov 0   ;;  %s2641_s0 = inlined_call_operand.vmem [shape: f32[2,8,2,8,8], index: 0, kind: input, shape index: {}]   ;;  %s2642_s1 = inlined_call_operand.vmem [shape: bf16[9,4,8], index: 1, kind: input, shape index: {}]   ;;  %s2643_s2 = inlined_call_operand.vmem [shape: bf16[2,8,8,8], index: 2, kind: output, shape index: {0}]   ;;  %s2644_s3 = inlined_call_operand.vmem [shape: f32[2,1,8], index: 3, kind: output, shape index: {1}]   ;;  %s2645_s4 = inlined_call_operand.vmem [shape: f32[2,1,8], index: 4, kind: output, shape index: {2}]  }
   0x1 LB: > { %s1773_s16 = sadd.s32 4294967295, %s2147_s15   ;;  %p1777_p0 = scmp.ge.s32.totalorder %s2147_s15, 1  ;;  %s2147_s15 = sphi %s2176_s15, %s15_s15  }
   0x2   : > { %p167_p1 = scmp.lt.s32.totalorder %s2147_s15, 3 }
   0x4   : > { %p168_p2 = pnand %p1777_p0, %p167_p1 }
   0x5   : > { %p199_p3 = scmp.lt.s32.totalorder (!%p168_p2), %s1773_s16, 1  ;;  %vm281_vm0 = vcmask (!%p168_p2), 27648   ;;  %vm283_vm1 = vcmask (!%p168_p2), 24576   ;;  %v2149_v0 = vmov (!%p168_p2), 0   ;;  %vm289_vm2 = vsmask.f32 (!%p168_p2), 256 }
   0x6   : > { %171 = sbr.rel (%p168_p2) target bundleno = 488 (0x1e8), region = 28  ;;  %282 = vst.msk [vmem:[#allocation2] sm:$0xf] (!%p168_p2), %vm281_vm0, %v2149_v0  ;;  %286 = vst.msk [vmem:[#allocation2 + $0x48] sm:$0xf] (!%p168_p2), %vm281_vm0, %v2149_v0  ;;  %s2150_s21 = smov (!%p168_p2), 124  }
   0x7   : > { %284 = vst.msk [vmem:[#allocation2 + $0x4] sm:$0x1] (!%p168_p2), %vm283_vm1, %v2149_v0  ;;  %287 = vst.msk [vmem:[#allocation2 + $0x4c] sm:$0x1] (!%p168_p2), %vm283_vm1, %v2149_v0  ;;  %v294_v1 = vld [vmem:[#allocation2 + $0x8] sm:$0x1] (!%p168_p2) }
   0x8   : > { %v297_v2 = vld [vmem:[#allocation2 + $0x10] sm:$0x1] (!%p168_p2)  ;;  %vm2191_vm3 = vmand (!%p168_p2), %vm283_vm1, %vm289_vm2  ;;  %vm321_vm4 = vsmask.f32 (!%p168_p2), 7938  ;;  %v326_v4 = vld [vmem:[#allocation2 + $0xc] sm:$0x1] (!%p168_p2) }
   0x9   : > { %v295_v5 = vsel (!%p168_p2), %vm2191_vm3, 0, %v294_v1  ;;  %v298_v6 = vsel (!%p168_p2), %vm2191_vm3, 0, %v297_v2  ;;  %vm2200_vm5 = vmand (!%p168_p2), %vm283_vm1, %vm321_vm4  ;;  %v329_v8 = vld [vmem:[#allocation2 + $0x14] sm:$0x1] (!%p168_p2)  ;;  %v306_v12 = vld [vmem:[#allocation2 + $0x28] sm:$0x1] (!%p168_p2) }
   0xa   : > { %296 = vst [vmem:[#allocation2 + $0x8] sm:$0x1] (!%p168_p2), %v295_v5  ;;  %299 = vst [vmem:[#allocation2 + $0x10] sm:$0x1] (!%p168_p2), %v298_v6  ;;  %v327_v9 = vsel (!%p168_p2), %vm2200_vm5, 0, %v326_v4  ;;  %v330_v10 = vsel (!%p168_p2), %vm2200_vm5, 0, %v329_v8 }
   0xb   : > { %vm2210_vm6 = vmand (!%p168_p2), %vm281_vm0, %vm321_vm4  ;;  %328 = vst [vmem:[#allocation2 + $0xc] sm:$0x1] (!%p168_p2), %v327_v9  ;;  %v338_v13 = vld [vmem:[#allocation2 + $0x2c] sm:$0x1] (!%p168_p2)  ;;  %v300_v14 = vld [vmem:[#allocation2 + $0x18] sm:$0x1] (!%p168_p2) }
   0xc   : > { %331 = vst [vmem:[#allocation2 + $0x14] sm:$0x1] (!%p168_p2), %v330_v10  ;;  %v307_v18 = vsel (!%p168_p2), %vm2191_vm3, 0, %v306_v12  ;;  %v339_v19 = vsel (!%p168_p2), %vm2200_vm5, 0, %v338_v13  ;;  %v301_v20 = vsel (!%p168_p2), %vm2191_vm3, 0, %v300_v14  ;;  %vm562_vm7 = vcmask (!%p168_p2), 1041408  }
   0xd   : > { %s2657_s16 = smov (!%p199_p3, %s1773_s16), 1  ;;  %308 = vst [vmem:[#allocation2 + $0x28] sm:$0x1] %v307_v18  ;;  %340 = vst [vmem:[#allocation2 + $0x2c] sm:$0x1] %v339_v19  ;;  %vm549_vm8 = vcmask 31744  }
   0xe   : > { %s1881_s17 = sshll.u32 %s2657_s16, 7  ;;  %302 = vst [vmem:[#allocation2 + $0x18] sm:$0x1] %v301_v20  ;;  %v318_v43 = vld [vmem:[#allocation2 + $0x48] sm:$0x1]  ;;  %vm1270_vm12 = vcmask 1042432   ;;  %s211_s22 = scalar_lea.vmem %s2644_s3, %s2657_s16 }
   0xf   : > { %s2217_s20 = scalar_lea.vmem %s2641_s0, %s1881_s17  ;;  %v323_v44 = vld [vmem:[#allocation2 + $0x4] sm:$0x1]  ;;  %v319_v47 = vsel %vm2191_vm3, 0, %v318_v43  ;;  %v350_v49 = vld [vmem:[#allocation2 + $0x4c] sm:$0x1]  ;;  %vm1271_vm13 = vcmask 1046532   ;;  %s214_s25 = scalar_lea.vmem %s2645_s4, %s2657_s16 }
  0x10   : > { %v216_v15 = vld [vmem:[%s2217_s20] sm:$0xff]  ;;  %v217_v16 = vld [vmem:[%s2217_s20 + $0x10] sm:$0xff]  ;;  %v1782_v17 = vld [vmem:[%s2217_s20 + $0x8] sm:$0xff]  ;;  %v324_v48 = vsel %vm2200_vm5, 0, %v323_v44  ;;  %320 = vst [vmem:[#allocation2 + $0x48] sm:$0x1] %v319_v47 }
  0x11   : > { %v1783_v21 = vld [vmem:[%s2217_s20 + $0x18] sm:$0xff]  ;;  %v2229_v22 = vmax.f32 %v216_v15, %v1782_v17  ;;  %v220_v23 = vld [vmem:[%s2217_s20 + $0x40] sm:$0xff]  ;;  %v221_v24 = vld [vmem:[%s2217_s20 + $0x50] sm:$0xff]  ;;  %325 = vst [vmem:[#allocation2 + $0x4] sm:$0x1] %v324_v48  ;;  %v351_v50 = vsel %vm2200_vm5, 0, %v350_v49 }
  0x12   : > { %v2233_v25 = vmax.f32 %v217_v16, %v1783_v21  ;;  %v1786_v26 = vld [vmem:[%s2217_s20 + $0x48] sm:$0xff]  ;;  %v1787_v27 = vld [vmem:[%s2217_s20 + $0x58] sm:$0xff]  ;;  %v218_v28 = vld [vmem:[%s2217_s20 + $0x20] sm:$0xff]  ;;  %352 = vst [vmem:[#allocation2 + $0x4c] sm:$0x1] %v351_v50  ;;  %s1882_s14 = sshll.u32 %s2657_s16, 5 }
  0x13   : > { %v2238_v29 = vmax.f32 %v220_v23, %v1786_v26  ;;  %v2240_v30 = vmax.f32 %v221_v24, %v1787_v27  ;;  %v219_v31 = vld [vmem:[%s2217_s20 + $0x30] sm:$0xff]  ;;  %v1784_v32 = vld [vmem:[%s2217_s20 + $0x28] sm:$0xff]  ;;  %v1785_v33 = vld [vmem:[%s2217_s20 + $0x38] sm:$0xff]  ;;  %vm821_vm9 = vsmask.f32 3328  ;;  %s2596_s19 = scalar_lea.vmem %s2643_s2, %s1882_s14  ;;  %vm1605_vm15 = vcmask 60416  }
  0x14   : > { %v2112_v34 = vpack.i.bf16 %v2233_v25, %v2229_v22  ;;  %v2247_v35 = vmax.f32 %v218_v28, %v1784_v32  ;;  %v2249_v36 = vmax.f32 %v219_v31, %v1785_v33  ;;  %v222_v37 = vld [vmem:[%s2217_s20 + $0x60] sm:$0xff]  ;;  %v223_v38 = vld [vmem:[%s2217_s20 + $0x70] sm:$0xff]  ;;  %v1788_v39 = vld [vmem:[%s2217_s20 + $0x68] sm:$0xff]  ;;  %vm822_vm10 = vsmask.f32 7440 }
  0x15   : > { %v2122_v40 = vpack.i.bf16 %v2240_v30, %v2238_v29  ;;  %v1789_v41 = vld [vmem:[%s2217_s20 + $0x78] sm:$0xff]  ;;  %v2257_v42 = vmax.f32 %v222_v37, %v1788_v39  ;;  %v309_v52 = vld [vmem:[#allocation2 + $0x30] sm:$0x1]  ;;  %v341_v53 = vld [vmem:[#allocation2 + $0x34] sm:$0x1]  ;;  %vm1614_vm0 = vcmask 64512  }
  0x16   : > { %2113 = vrot.lane.b32.xlu0 %v2112_v34, %s2150_s21  ;;  %v2117_v45 = vpack.i.bf16 %v2249_v36, %v2247_v35  ;;  %v2261_v46 = vmax.f32 %v223_v38, %v1789_v41  ;;  %v310_v54 = vsel %vm2191_vm3, 0, %v309_v52  ;;  %v342_v55 = vsel %vm2200_vm5, 0, %v341_v53  ;;  %v303_v56 = vld [vmem:[#allocation2 + $0x20] sm:$0x1]  ;;  %v332_v57 = vld [vmem:[#allocation2 + $0x1c] sm:$0x1]  ;;  %vm2382_vm11 = vmor %vm821_vm9, %vm822_vm10 }
  0x17   : > { %2123 = vrot.lane.b32.xlu1 %v2122_v40, %s2150_s21  ;;  %311 = vst [vmem:[#allocation2 + $0x30] sm:$0x1] %v310_v54  ;;  %343 = vst [vmem:[#allocation2 + $0x34] sm:$0x1] %v342_v55  ;;  %v335_v58 = vld [vmem:[#allocation2 + $0x24] sm:$0x1] }
  0x18   : > { %v2127_v51 = vpack.i.bf16 %v2261_v46, %v2257_v42  ;;  %v304_v59 = vsel %vm2191_vm3, 0, %v303_v56  ;;  %v333_v60 = vsel %vm2200_vm5, 0, %v332_v57  ;;  %v336_v61 = vsel %vm2200_vm5, 0, %v335_v58  ;;  %v291_v62 = vld [vmem:[#allocation2] sm:$0x1]  ;;  %vm2504_vm14 = vmor %vm1270_vm12, %vm1271_vm13 }
  0x19   : > { %305 = vst [vmem:[#allocation2 + $0x20] sm:$0x1] %v304_v59  ;;  %334 = vst [vmem:[#allocation2 + $0x1c] sm:$0x1] %v333_v60  ;;  %v312_v63 = vld [vmem:[#allocation2 + $0x38] sm:$0x1] }
  0x1a   : > { %2118 = vrot.lane.b32.xlu0 %v2117_v45, %s2150_s21  ;;  %337 = vst [vmem:[#allocation2 + $0x24] sm:$0x1] %v336_v61  ;;  %v315_v0 = vld [vmem:[#allocation2 + $0x40] sm:$0x1]  ;;  %v292_v1 = vsel %vm2191_vm3, 0, %v291_v62  ;;  %v313_v2 = vsel %vm2191_vm3, 0, %v312_v63 }
  0x1b   : > { %2128 = vrot.lane.b32.xlu1 %v2127_v51, %s2150_s21  ;;  %v316_v4 = vsel %vm2191_vm3, 0, %v315_v0  ;;  %293 = vst [vmem:[#allocation2] sm:$0x1] %v292_v1  ;;  %314 = vst [vmem:[#allocation2 + $0x38] sm:$0x1] %v313_v2  ;;  %vm1636_vm1 = vcmask 57344  }
  0x1c   : > { %317 = vst [vmem:[#allocation2 + $0x40] sm:$0x1] %v316_v4  ;;  %v344_v5 = vld [vmem:[#allocation2 + $0x3c] sm:$0x1]  ;;  %v347_v8 = vld [vmem:[#allocation2 + $0x44] sm:$0x1] }
  0x1d   : > { %v345_v6 = vsel %vm2200_vm5, 0, %v344_v5  ;;  %v348_v9 = vsel %vm2200_vm5, 0, %v347_v8  ;;  %v1798_v10 = vld [vmem:[%s2642_s1 + $0x6] sm:$0x3]  ;;  %v2299_v13 = vld [vmem:[%s2642_s1 + $0x8] sm:$0x3] }
  0x1e   : > { %346 = vst [vmem:[#allocation2 + $0x3c] sm:$0x1] %v345_v6  ;;  %349 = vst [vmem:[#allocation2 + $0x44] sm:$0x1] %v348_v9  ;;  %2092 = vmatprep.subr.msk.bf16.mxu1 %vm562_vm7, %v1798_v10  ;;  %v564_v12 = vsel %vm562_vm7, %v1798_v10, 0  ;;  %2096 = vmatprep.subr.msk.bf16.mxu0 %vm562_vm7, %v2299_v13  ;;  %v2305_v7 = vsel %vm562_vm7, %v2299_v13, 0 }
  0x1f   : > { %1937 = vmatpush3.bf16.msra.mxu1 %v564_v12  ;;  %1977 = vmatpush3.bf16.msra.mxu0 %v2305_v7  ;;  %v2311_v14 = vld [vmem:[%s2642_s1] sm:$0x3]  ;;  %v2316_v15 = vld [vmem:[%s2642_s1 + $0xe] sm:$0x3]  ;;  %v468_v47 = vld [vmem:[#allocation2 + $0x8] sm:$0xf] }
  0x20   : > { %2093 = vmatprep.subr.msk.bf16.mxu1 %vm562_vm7, %v2311_v14  ;;  %2098 = vmatprep.subr.msk.bf16.mxu0 %vm562_vm7, %v2316_v15  ;;  %v474_v50 = vld [vmem:[#allocation2 + $0x10] sm:$0xf]  ;;  %v477_v51 = vld [vmem:[#allocation2 + $0x14] sm:$0x1]  ;;  %v492_v56 = vld [vmem:[#allocation2 + $0x28] sm:$0xf] }
  0x21   : > { %v495_v57 = vld [vmem:[#allocation2 + $0x2c] sm:$0x1]  ;;  %v498_v2 = vld [vmem:[#allocation2 + $0x30] sm:$0xf]  ;;  %v501_v4 = vld [vmem:[#allocation2 + $0x34] sm:$0x1] }
  0x88   : > { %v2114_v16 = vpop.permute.xlu0 %2113 }
  0x89   : > { %v2116_v17 = vunpack.i.h.bf16 %v2114_v16  ;;  %v2115_v18 = vunpack.i.l.bf16 %v2114_v16  ;;  %v2124_v19 = vpop.permute.xlu1 %2123 }
  0x8a   : > { %v2126_v20 = vunpack.i.h.bf16 %v2124_v19  ;;  %v2125_v21 = vunpack.i.l.bf16 %v2124_v19 }
  0x8b   : > { %v274_v23 = vmax.f32 %v2233_v25, %v2116_v17  ;;  %v273_v24 = vmax.f32 %v2229_v22, %v2115_v18  ;;  %v471_v22 = vld [vmem:[#allocation2 + $0xc] sm:$0x1] }
  0x8c   : > { %v278_v26 = vmax.f32 %v2240_v30, %v2126_v20  ;;  %v277_v27 = vmax.f32 %v2238_v29, %v2125_v21  ;;  %v2119_v28 = vpop.permute.xlu0 %2118 }
  0x8d   : > { %v1884_v31 = vpack.c.bf16 %v274_v23, %v274_v23  ;;  %v1883_v32 = vpack.c.bf16 %v273_v24, %v273_v24  ;;  %v2121_v33 = vunpack.i.h.bf16 %v2119_v28  ;;  %v2120_v34 = vunpack.i.l.bf16 %v2119_v28  ;;  %v2129_v37 = vpop.permute.xlu1 %2128  ;;  %v486_v28 = vld [vmem:[#allocation2 + $0x20] sm:$0xf] }
  0x8e   : > { %v1888_v38 = vpack.c.bf16 %v278_v26, %v278_v26  ;;  %v1887_v39 = vpack.c.bf16 %v277_v27, %v277_v27  ;;  %v2131_v40 = vunpack.i.h.bf16 %v2129_v37  ;;  %v2130_v41 = vunpack.i.l.bf16 %v2129_v37  ;;  %v480_v26 = vld [vmem:[#allocation2 + $0x18] sm:$0xf]  ;;  %v483_v27 = vld [vmem:[#allocation2 + $0x1c] sm:$0x1] }
  0x8f   : > { %v394_v43 = vshrl.u32 %v1884_v31, 16  ;;  %v397_v44 = vshll.u32 %v1884_v31, 16  ;;  %v386_v45 = vshrl.u32 %v1883_v32, 16  ;;  %v389_v25 = vshll.u32 %v1883_v32, 16  ;;  %v489_v31 = vld [vmem:[#allocation2 + $0x24] sm:$0x1] }
  0x90   : > { %v426_v48 = vshrl.u32 %v1888_v38, 16  ;;  %v429_v30 = vshll.u32 %v1888_v38, 16  ;;  %v418_v49 = vshrl.u32 %v1887_v39, 16  ;;  %v421_v29 = vshll.u32 %v1887_v39, 16 }
  0x91   : > { %v396_v52 = vrot.slane %v394_v43, 7  ;;  %v388_v53 = vrot.slane %v386_v45, 7  ;;  %v276_v54 = vmax.f32 %v2249_v36, %v2121_v33  ;;  %v275_v55 = vmax.f32 %v2247_v35, %v2120_v34  ;;  %v504_v43 = vld [vmem:[#allocation2 + $0x38] sm:$0xf]  ;;  %v510_v45 = vld [vmem:[#allocation2 + $0x40] sm:$0xf] }
  0x92   : > { %v428_v58 = vrot.slane %v426_v48, 7  ;;  %v420_v59 = vrot.slane %v418_v49, 7  ;;  %v280_v60 = vmax.f32 %v2261_v46, %v2131_v40  ;;  %v279_v61 = vmax.f32 %v2257_v42, %v2130_v41 }
  0x93   : > { %v399_v62 = vor.u32 %v397_v44, %v396_v52  ;;  %v400_v63 = vrot.slane %v396_v52, 4  ;;  %v391_v0 = vor.u32 %v389_v25, %v388_v53  ;;  %v392_v1 = vrot.slane %v388_v53, 4  ;;  %v507_v44 = vld [vmem:[#allocation2 + $0x3c] sm:$0x1] }
  0x94   : > { %v431_v5 = vor.u32 %v429_v30, %v428_v58  ;;  %v432_v6 = vrot.slane %v428_v58, 4  ;;  %v423_v8 = vor.u32 %v421_v29, %v420_v59  ;;  %v424_v36 = vrot.slane %v420_v59, 4  ;;  %v513_v29 = vld [vmem:[#allocation2 + $0x44] sm:$0x1] }
  0x95   : > { %v475_v35 = vsel %vm2210_vm6, %v399_v62, %v474_v50  ;;  %v478_v9 = vsel %vm2191_vm3, %v400_v63, %v477_v51  ;;  %v469_v46 = vsel %vm2210_vm6, %v391_v0, %v468_v47  ;;  %v472_v42 = vsel %vm2191_vm3, %v392_v1, %v471_v22 }
  0x96   : > { %476 = vst [vmem:[#allocation2 + $0x10] sm:$0xf] %v475_v35  ;;  %479 = vst [vmem:[#allocation2 + $0x14] sm:$0x1] %v478_v9  ;;  %v499_v10 = vsel %vm2210_vm6, %v431_v5, %v498_v2  ;;  %v502_v12 = vsel %vm2191_vm3, %v432_v6, %v501_v4  ;;  %v493_v16 = vsel %vm2210_vm6, %v423_v8, %v492_v56 }
  0x97   : > { %470 = vst [vmem:[#allocation2 + $0x8] sm:$0xf] %v469_v46  ;;  %473 = vst [vmem:[#allocation2 + $0xc] sm:$0x1] %v472_v42  ;;  %v496_v17 = vsel %vm2191_vm3, %v424_v36, %v495_v57  ;;  %v1886_v18 = vpack.c.bf16 %v276_v54, %v276_v54  ;;  %v1885_v19 = vpack.c.bf16 %v275_v55, %v275_v55 }
  0x98   : > { %500 = vst [vmem:[#allocation2 + $0x30] sm:$0xf] %v499_v10  ;;  %503 = vst [vmem:[#allocation2 + $0x34] sm:$0x1] %v502_v12  ;;  %v1890_v20 = vpack.c.bf16 %v280_v60, %v280_v60  ;;  %v1889_v21 = vpack.c.bf16 %v279_v61, %v279_v61 }
  0x99   : > { %494 = vst [vmem:[#allocation2 + $0x28] sm:$0xf] %v493_v16  ;;  %497 = vst [vmem:[#allocation2 + $0x2c] sm:$0x1] %v496_v17  ;;  %v410_v23 = vshrl.u32 %v1886_v18, 16  ;;  %v402_v24 = vshrl.u32 %v1885_v19, 16 }
  0x9a   : > { %v442_v32 = vshrl.u32 %v1890_v20, 16  ;;  %v445_v33 = vshll.u32 %v1890_v20, 16  ;;  %v434_v34 = vshrl.u32 %v1889_v21, 16  ;;  %v437_v37 = vshll.u32 %v1889_v21, 16 }
  0x9b   : > { %v412_v38 = vrot.slane %v410_v23, 7  ;;  %v413_v39 = vshll.u32 %v1886_v18, 16  ;;  %v404_v40 = vrot.slane %v402_v24, 7  ;;  %v405_v41 = vshll.u32 %v1885_v19, 16 }
  0x9c   : > { %v444_v25 = vrot.slane %v442_v32, 7  ;;  %v436_v47 = vrot.slane %v434_v34, 7  ;;  %v650_v19 = vsel %vm562_vm7, %v2311_v14, 0 }
  0x9d   : > { %v415_v22 = vor.u32 %v413_v39, %v412_v38  ;;  %v416_v48 = vrot.slane %v412_v38, 4  ;;  %v407_v30 = vor.u32 %v405_v41, %v404_v40  ;;  %v408_v49 = vrot.slane %v404_v40, 4  ;;  %v2348_v55 = vld [vmem:[#allocation2 + $0x10] sm:$0xf]  ;;  %v2360_v63 = vld [vmem:[#allocation2 + $0x14] sm:$0x1] }
  0x9e   : > { %v2346_v50 = vld [vmem:[#allocation2 + $0x8] sm:$0xf]  ;;  %v447_v51 = vor.u32 %v445_v33, %v444_v25  ;;  %v448_v52 = vrot.slane %v444_v25, 4  ;;  %v439_v53 = vor.u32 %v437_v37, %v436_v47  ;;  %v440_v54 = vrot.slane %v436_v47, 4  ;;  %v2358_v61 = vld [vmem:[#allocation2 + $0xc] sm:$0x1] }
  0x9f   : > { %v803_v56 = vld [vmem:[#allocation2 + $0x8] sm:$0xf]  ;;  %v487_v57 = vsel %vm2210_vm6, %v415_v22, %v486_v28  ;;  %v490_v58 = vsel %vm2191_vm3, %v416_v48, %v489_v31  ;;  %v481_v59 = vsel %vm2210_vm6, %v407_v30, %v480_v26  ;;  %v484_v60 = vsel %vm2191_vm3, %v408_v49, %v483_v27  ;;  %v805_v62 = vld [vmem:[#allocation2 + $0x10] sm:$0xf] }
  0xa0   : > { %488 = vst [vmem:[#allocation2 + $0x20] sm:$0xf] %v487_v57  ;;  %491 = vst [vmem:[#allocation2 + $0x24] sm:$0x1] %v490_v58  ;;  %v511_v0 = vsel %vm2210_vm6, %v447_v51, %v510_v45  ;;  %v514_v1 = vsel %vm2191_vm3, %v448_v52, %v513_v29  ;;  %v505_v2 = vsel %vm2210_vm6, %v439_v53, %v504_v43  ;;  %v839_v6 = vshrl.u32 %v803_v56, 16 }
  0xa1   : > { %482 = vst [vmem:[#allocation2 + $0x18] sm:$0xf] %v481_v59  ;;  %485 = vst [vmem:[#allocation2 + $0x1c] sm:$0x1] %v484_v60  ;;  %v508_v4 = vsel %vm2191_vm3, %v440_v54, %v507_v44  ;;  %v1799_v5 = vcombine.low %v2346_v50, %v2348_v55  ;;  %v842_v8 = vshll.u32 %v803_v56, 16  ;;  %v848_v35 = vshll.u32 %v2358_v61, 16 }
  0xa2   : > { %512 = vst [vmem:[#allocation2 + $0x40] sm:$0xf] %v511_v0  ;;  %515 = vst [vmem:[#allocation2 + $0x44] sm:$0x1] %v514_v1  ;;  %v2372_v36 = vld [vmem:[#allocation2 + $0x28] sm:$0xf] }
  0xa3   : > { %506 = vst [vmem:[#allocation2 + $0x38] sm:$0xf] %v505_v2  ;;  %509 = vst [vmem:[#allocation2 + $0x3c] sm:$0x1] %v508_v4  ;;  %v853_v9 = vshrl.u32 %v805_v62, 16  ;;  %v856_v46 = vshll.u32 %v805_v62, 16  ;;  %1938 = vmatprep.mubr.msk.bf16.mxu1 %vm549_vm8, %v1799_v5 }
  0xa4   : > { %v862_v11 = vshll.u32 %v2360_v63, 16  ;;  %v841_v3 = vrot.slane %v839_v6, 4  ;;  %v844_v42 = vrot.slane %v842_v8, 5  ;;  %v2377_v16 = vld [vmem:[#allocation2 + $0x30] sm:$0xf]  ;;  %v895_v18 = vshrl.u32 %v2372_v36, 16 }
  0xa5   : > { %v855_v10 = vrot.slane %v853_v9, 4  ;;  %v858_v12 = vrot.slane %v856_v46, 5  ;;  %v850_v21 = vrot.slane %v848_v35, 5  ;;  %v898_v26 = vshll.u32 %v2372_v36, 16  ;;  %v2387_v27 = vld [vmem:[#allocation2 + $0x28] sm:$0xf] }
  0xa6   : > { %v845_v17 = vor.u32 %v844_v42, %v841_v3  ;;  %v864_v24 = vrot.slane %v862_v11, 5  ;;  %v1801_v33 = vcombine.low %v2387_v27, %v2377_v16  ;;  %v2404_v44 = vld [vmem:[%s2642_s1 + $0xc] sm:$0x3]  ;;  %v813_v51 = vld [vmem:[#allocation2 + $0x30] sm:$0xf]  ;;  %v1169_v59 = vsel %vm562_vm7, %v2316_v15, 0 }
  0xa7   : > { %v859_v23 = vor.u32 %v858_v12, %v855_v10  ;;  %v2391_v31 = vld [vmem:[#allocation2 + $0x20] sm:$0xf]  ;;  %v2399_v38 = vld [vmem:[#allocation2 + $0x24] sm:$0x1]  ;;  %v819_v52 = vld [vmem:[#allocation2 + $0x48] sm:$0xf] }
  0xa8   : > { %v2389_v28 = vld [vmem:[#allocation2 + $0x18] sm:$0xf]  ;;  %v2397_v34 = vld [vmem:[#allocation2 + $0x1c] sm:$0x1]  ;;  %v809_v37 = vld [vmem:[#allocation2 + $0x20] sm:$0xf] }
  0xa9   : > { %v807_v32 = vld [vmem:[#allocation2 + $0x18] sm:$0xf]  ;;  %v1800_v14 = vcombine.low %v2389_v28, %v2391_v31  ;;  %v846_v39 = vrot.slane %v845_v17, 4  ;;  %v860_v40 = vrot.slane %v859_v23, 4  ;;  %v876_v45 = vshll.u32 %v2397_v34, 16 }
  0xaa   : > { %v867_v41 = vshrl.u32 %v807_v32, 16  ;;  %v870_v43 = vshll.u32 %v807_v32, 16  ;;  %v881_v25 = vshrl.u32 %v809_v37, 16  ;;  %v884_v47 = vshll.u32 %v809_v37, 16  ;;  %v2416_v56 = vld [vmem:[#allocation2 + $0x38] sm:$0xf] }
  0xab   : > { %1939 = vmatmul.mubr.msk.bf16.vlgmr.msra.gmra.mrb[0].mxu1 %vm549_vm8, %v1800_v14  ;;  %v890_v22 = vshll.u32 %v2399_v38, 16  ;;  %v2411_v48 = vsel %vm2382_vm11, %v846_v39, %v850_v21  ;;  %v865_v30 = vsel %vm2382_vm11, %v860_v40, %v864_v24  ;;  %v2418_v57 = vld [vmem:[#allocation2 + $0x40] sm:$0xf]  ;;  %v897_v0 = vrot.slane %v895_v18, 4  ;;  %v815_v2 = vld [vmem:[#allocation2 + $0x38] sm:$0xf] }
  0xac   : > { %v869_v49 = vrot.slane %v867_v41, 4  ;;  %v872_v29 = vrot.slane %v870_v43, 5  ;;  %1942 = vmatprep.mubr.msk.bf16.mxu1 %vm549_vm8, %v1801_v33  ;;  %1947 = vmatpush3.bf16.msra.mxu1 %v650_v19  ;;  %v883_v53 = vrot.slane %v881_v25, 4  ;;  %v886_v54 = vrot.slane %v884_v47, 5  ;;  %v516_v60 = vld [vmem:[#allocation2] sm:$0xf] }
  0xad   : > { %2094 = vmatprep.subr.msk.bf16.mxu1 %vm562_vm7, %v2404_v44  ;;  %v1831_v1 = vcombine.low %v2411_v48, %v865_v30  ;;  %v1148_v4 = vshrl.u32 %v819_v52, 16  ;;  %v878_v6 = vrot.slane %v876_v45, 5  ;;  %v1802_v8 = vcombine.low %v2416_v56, %v2418_v57  ;;  %v817_v12 = vld [vmem:[#allocation2 + $0x40] sm:$0xf]  ;;  %v1853_v19 = vld [vmem:[%s2642_s1 + $0x4] sm:$0x3] }
  0xae   : > { %v873_v58 = vor.u32 %v872_v29, %v869_v49  ;;  %v887_v62 = vor.u32 %v886_v54, %v883_v53  ;;  %v909_v36 = vshrl.u32 %v813_v51, 16  ;;  %v892_v9 = vrot.slane %v890_v22, 5  ;;  %v2445_v39 = vld [vmem:[#allocation2 + $0x3c] sm:$0x1] }
  0xaf   : > { %v900_v46 = vrot.slane %v898_v26, 5  ;;  %1978 = vmatprep.mubr.msk.bf16.mxu0 %vm549_vm8, %v1831_v1  ;;  %v912_v11 = vshll.u32 %v813_v51, 16  ;;  %v1807_v15 = vcombine.low %v516_v60, %v2346_v50  ;;  %v923_v10 = vshrl.u32 %v815_v2, 16  ;;  %v2439_v50 = vld [vmem:[#allocation2 + $0x2c] sm:$0x1] }
  0xb0   : > { %v874_v5 = vrot.slane %v873_v58, 4  ;;  %v888_v35 = vrot.slane %v887_v62, 4  ;;  %v911_v42 = vrot.slane %v909_v36, 4  ;;  %v1151_v23 = vshll.u32 %v819_v52, 16  ;;  %v2442_v26 = vld [vmem:[#allocation2 + $0x34] sm:$0x1] }
  0xb1   : > { %v914_v21 = vrot.slane %v912_v11, 5  ;;  %v925_v32 = vrot.slane %v923_v10, 4  ;;  %v926_v33 = vshll.u32 %v815_v2, 16  ;;  %v901_v14 = vor.u32 %v900_v46, %v897_v0  ;;  %v802_v2 = vld [vmem:[#allocation2 + $0x4] sm:$0x1] }
  0xb2   : > { %v879_v3 = vsel %vm2382_vm11, %v874_v5, %v878_v6  ;;  %v893_v17 = vsel %vm2382_vm11, %v888_v35, %v892_v9  ;;  %v904_v37 = vshll.u32 %v2439_v50, 16  ;;  %v918_v40 = vshll.u32 %v2442_v26, 16  ;;  %v1244_v11 = vld [vmem:[#allocation2] sm:$0xe] }
  0xb3   : > { %v2433_v18 = vcombine.low %v865_v30, %v879_v3  ;;  %1943 = vmatmul.mubr.msk.bf16.gmra.mrb[4].mxu1 %vm549_vm8, %v1802_v8  ;;  %v1832_v24 = vcombine.low %v879_v3, %v893_v17  ;;  %v1039_v41 = vshrl.u32 %v817_v12, 16  ;;  %v915_v43 = vor.u32 %v914_v21, %v911_v42 }
  0xb4   : > { %1948 = vmatprep.mubr.msk.bf16.mxu1 %vm549_vm8, %v1807_v15  ;;  %v928_v45 = vrot.slane %v926_v33, 5  ;;  %v932_v25 = vshll.u32 %v2445_v39, 16  ;;  %v1042_v47 = vshll.u32 %v817_v12, 16  ;;  %v1150_v22 = vrot.slane %v1148_v4, 4  ;;  %v1245_v15 = vld [vmem:[#allocation2 + $0x8] sm:$0xe] }
  0xb5   : > { %1979 = vmatmul.mubr.msk.bf16.vlgmr.msra.gmra.mrb[0].mxu0 %vm549_vm8, %v1832_v24  ;;  %v1153_v30 = vrot.slane %v1151_v23, 5  ;;  %v1808_v49 = vcombine.low %v2348_v55, %v2389_v28  ;;  %v2456_v29 = vcombine.low %v2391_v31, %v2387_v27  ;;  %v726_v52 = vsel %vm562_vm7, %v2404_v44, 0  ;;  %v1821_v55 = vld [vmem:[%s2642_s1 + $0x2] sm:$0x3]  ;;  %v2467_v28 = vld [vmem:[#allocation2 + $0x44] sm:$0x1] }
  0xb6   : > { %1987 = vmatpush3.bf16.msra.mxu0 %v1169_v59  ;;  %1988 = vmatprep.mubr.msk.bf16.mxu0 %vm549_vm8, %v2433_v18  ;;  %v929_v51 = vor.u32 %v928_v45, %v925_v32  ;;  %v902_v53 = vrot.slane %v901_v14, 4  ;;  %v906_v54 = vrot.slane %v904_v37, 5  ;;  %v1041_v58 = vrot.slane %v1039_v41, 4  ;;  %v801_v27 = vld [vmem:[#allocation2] sm:$0xf] }
  0xb7   : > { %2099 = vmatprep.subr.msk.bf16.mxu0 %vm562_vm7, %v1853_v19  ;;  %v1044_v59 = vrot.slane %v1042_v47, 5  ;;  %v916_v60 = vrot.slane %v915_v43, 4  ;;  %v920_v62 = vrot.slane %v918_v40, 5  ;;  %v934_v1 = vrot.slane %v932_v25, 5  ;;  %v2469_v31 = vld [vmem:[#allocation2 + $0x4c] sm:$0x1] }
  0xb8   : > { %v930_v0 = vrot.slane %v929_v51, 4  ;;  %v1154_v44 = vor.u32 %v1153_v30, %v1150_v22  ;;  %v2473_v4 = vsel %vm2382_vm11, %v902_v53, %v906_v54  ;;  %v1048_v6 = vshll.u32 %v2467_v28, 16  ;;  %v1863_v33 = vld [vmem:[%s2642_s1 + $0xa] sm:$0x3]  ;;  %v1247_v43 = vld [vmem:[#allocation2 + $0x18] sm:$0xe] }
  0xb9   : > { %v1045_v5 = vor.u32 %v1044_v59, %v1041_v58  ;;  %v1157_v8 = vshll.u32 %v2469_v31, 16  ;;  %v825_v36 = vshrl.u32 %v801_v27, 16  ;;  %v828_v35 = vshll.u32 %v801_v27, 16  ;;  %v1248_v47 = vld [vmem:[#allocation2 + $0x20] sm:$0xe] }
  0xba   : > { %v2480_v9 = vsel %vm2382_vm11, %v916_v60, %v920_v62  ;;  %v2484_v46 = vsel %vm2382_vm11, %v930_v0, %v934_v1  ;;  %v2487_v3 = vcombine.low %v893_v17, %v2473_v4  ;;  %v1275_v42 = vrot.slane %v802_v2, 5  ;;  %v1249_v22 = vld [vmem:[#allocation2 + $0x28] sm:$0xe] }
  0xbb   : > { %1949 = vmatmul.mubr.msk.bf16.vlgmr.msra.gmra.mrb[0].mxu1 %vm549_vm8, %v1808_v49  ;;  %v1332_v10 = vsel %vm562_vm7, %v1853_v19, 0  ;;  %v1155_v12 = vrot.slane %v1154_v44, 4  ;;  %v2492_v21 = vcombine.low %v2480_v9, %v2484_v46  ;;  %v1046_v23 = vrot.slane %v1045_v5, 4 }
  0xbc   : > { %1952 = vmatprep.mubr.msk.bf16.mxu1 %vm549_vm8, %v2456_v29  ;;  %1957 = vmatpush3.bf16.msra.mxu1 %v726_v52  ;;  %v1050_v24 = vrot.slane %v1048_v6, 5  ;;  %v1159_v32 = vrot.slane %v1157_v8, 5  ;;  %v1279_v14 = vrot.slane %v2358_v61, 5  ;;  %v1810_v17 = vcombine.low %v2377_v16, %v2416_v56  ;;  %v1246_v52 = vld [vmem:[#allocation2 + $0x10] sm:$0xe] }
  0xbd   : > { %2095 = vmatprep.subr.msk.bf16.mxu1 %vm562_vm7, %v1821_v55  ;;  %v1845_v19 = vrot.slane %v1244_v11, 9  ;;  %v1846_v37 = vrot.slane %v1245_v15, 9  ;;  %v827_v41 = vrot.slane %v825_v36, 4  ;;  %v830_v61 = vrot.slane %v828_v35, 5  ;;  %v525_v6 = vld [vmem:[#allocation2 + $0x48] sm:$0xf] }
  0xbe   : > { %v2515_v16 = vsel %vm2382_vm11, %v1046_v23, %v1050_v24  ;;  %v1160_v56 = vsel %vm2382_vm11, %v1155_v12, %v1159_v32  ;;  %v834_v51 = vshll.u32 %v802_v2, 16  ;;  %v1848_v53 = vrot.slane %v1247_v43, 9 }
  0xbf   : > { %v1276_v45 = vsel %vm2504_vm14, %v1845_v19, %v1275_v42  ;;  %v1280_v25 = vsel %vm2504_vm14, %v1846_v37, %v1279_v14  ;;  %v831_v30 = vor.u32 %v830_v61, %v827_v41  ;;  %v1287_v54 = vrot.slane %v2397_v34, 5  ;;  %v1253_v37 = vld [vmem:[#allocation2 + $0x48] sm:$0xe] }
  0xc0   : > { %v1854_v58 = vcombine.low %v1276_v45, %v1280_v25  ;;  %v963_v59 = vsel %vm562_vm7, %v1821_v55, 0  ;;  %v1849_v60 = vrot.slane %v1248_v47, 9  ;;  %v1291_v62 = vrot.slane %v2399_v38, 5  ;;  %v1250_v38 = vld [vmem:[#allocation2 + $0x30] sm:$0xe] }
  0xc1   : > { %1989 = vmatmul.mubr.msk.bf16.vlgmr.msra.gmra.mrb[0].mxu0 %vm549_vm8, %v2487_v3  ;;  %v1850_v0 = vrot.slane %v1249_v22, 9  ;;  %v1295_v1 = vrot.slane %v2439_v50, 5  ;;  %v1847_v27 = vrot.slane %v1246_v52, 9  ;;  %v1283_v44 = vrot.slane %v2360_v63, 5  ;;  %v1251_v55 = vld [vmem:[#allocation2 + $0x38] sm:$0xe] }
  0xc2   : > { %1997 = vmatpush3.bf16.msra.mxu0 %v1332_v10  ;;  %1992 = vmatprep.mubr.msk.bf16.mxu0 %vm549_vm8, %v2492_v21  ;;  %v832_v2 = vrot.slane %v831_v30, 4  ;;  %v836_v5 = vrot.slane %v834_v51, 5  ;;  %v1288_v34 = vsel %vm2504_vm14, %v1848_v53, %v1287_v54  ;;  %v1292_v50 = vsel %vm2504_vm14, %v1849_v60, %v1291_v62 }
  0xc3   : > { %1953 = vmatmul.mubr.msk.bf16.gmra.mrb[4].mxu1 %vm549_vm8, %v1810_v17  ;;  %2100 = vmatprep.subr.msk.bf16.mxu0 %vm562_vm7, %v1863_v33  ;;  %v1296_v63 = vsel %vm2504_vm14, %v1850_v0, %v1295_v1  ;;  %v1433_v35 = vsel %vm562_vm7, %v1863_v33, 0  ;;  %v1851_v11 = vrot.slane %v1250_v38, 9  ;;  %v1299_v42 = vrot.slane %v2442_v26, 5 }
  0xc4   : > { %1958 = vmatprep.mubr.msk.bf16.mxu1 %vm549_vm8, %v1808_v49  ;;  %v1840_v49 = vcombine.low %v2515_v16, %v1160_v56  ;;  %v837_v8 = vsel %vm2382_vm11, %v832_v2, %v836_v5  ;;  %v1856_v15 = vcombine.low %v1292_v50, %v1296_v63  ;;  %v1852_v10 = vrot.slane %v1251_v55, 9 }
  0xc5   : > { %v1303_v12 = vrot.slane %v2445_v39, 5  ;;  %v1816_v23 = vcombine.low %v2418_v57, %v525_v6  ;;  %v1822_v20 = vcombine.low %v837_v8, %v2411_v48  ;;  %v1300_v26 = vsel %vm2504_vm14, %v1851_v11, %v1299_v42  ;;  %v1252_v48 = vld [vmem:[#allocation2 + $0x40] sm:$0xe] }
  0xc6   : > { %v1865_v57 = vcombine.low %v1288_v34, %v1292_v50  ;;  %v1866_v14 = vcombine.low %v1296_v63, %v1300_v26  ;;  %v1411_v19 = vrot.slane %v2467_v28, 5  ;;  %v1834_v28 = vcombine.low %v2484_v46, %v2515_v16 }
  0xc7   : > { %v1304_v39 = vsel %vm2504_vm14, %v1852_v10, %v1303_v12 }
  0xc8   : > { %v1857_v24 = vcombine.low %v1300_v26, %v1304_v39 }
  0xc9   : > { %1993 = vmatmul.mubr.msk.bf16.gmra.mrb[4].mxu0 %vm549_vm8, %v1840_v49 }
  0xca   : > { %1998 = vmatprep.mubr.msk.bf16.mxu0 %vm549_vm8, %v1854_v58 }
  0xcb   : > { %1959 = vmatmul.mubr.msk.bf16.vlgmr.msra.gmra.mrb[0].mxu1 %vm549_vm8, %v2456_v29  ;;  %v1284_v29 = vsel %vm2504_vm14, %v1847_v27, %v1283_v44 }
  0xcc   : > { %1962 = vmatprep.mubr.msk.bf16.mxu1 %vm549_vm8, %v1810_v17  ;;  %1967 = vmatpush3.bf16.msra.mxu1 %v963_v59  ;;  %v1855_v36 = vcombine.low %v1284_v29, %v1288_v34  ;;  %v1864_v32 = vcombine.low %v1280_v25, %v1284_v29  ;;  %v1862_v17 = vrot.slane %v1252_v48, 9 }
  0xcd   : > { %2097 = vmatprep.subr.msk.bf16.mxu1 %vm562_vm7, %v2299_v13  ;;  %v1873_v13 = vld [vmem:[%s2642_s1 + $0x10] sm:$0x3] }
  0xce   : > { %v1522_v33 = vsel %vm562_vm7, %v1873_v13, 0 }
  0xd1   : > { %1999 = vmatmul.mubr.msk.bf16.vlgmr.msra.gmra.mrb[0].mxu0 %vm549_vm8, %v1855_v36 }
  0xd2   : > { %2007 = vmatpush3.bf16.msra.mxu0 %v1433_v35  ;;  %2002 = vmatprep.mubr.msk.bf16.mxu0 %vm549_vm8, %v1856_v15 }
  0xd3   : > { %1963 = vmatmul.mubr.msk.bf16.gmra.mrb[4].mxu1 %vm549_vm8, %v1816_v23  ;;  %2101 = vmatprep.subr.msk.bf16.mxu0 %vm562_vm7, %v1873_v13 }
  0xd4   : > { %1968 = vmatprep.mubr.msk.bf16.mxu1 %vm549_vm8, %v1822_v20 }
  0xd9   : > { %2003 = vmatmul.mubr.msk.bf16.gmra.mrb[4].mxu0 %vm549_vm8, %v1857_v24 }
  0xda   : > { %2008 = vmatprep.mubr.msk.bf16.mxu0 %vm549_vm8, %v1864_v32 }
  0xdb   : > { %1969 = vmatmul.mubr.msk.bf16.vlgmr.msra.gmra.mrb[0].mxu1 %vm549_vm8, %v2433_v18  ;;  %v1833_v18 = vcombine.low %v2473_v4, %v2480_v9  ;;  %v1872_v4 = vrot.slane %v1253_v37, 9  ;;  %v1512_v9 = vrot.slane %v2469_v31, 5 }
  0xdc   : > { %1972 = vmatprep.mubr.msk.bf16.mxu1 %vm549_vm8, %v2487_v3  ;;  %2027 = vmatpush3.bf16.msra.mxu1 %v2305_v7  ;;  %v1412_v7 = vsel %vm2504_vm14, %v1862_v17, %v1411_v19 }
  0xdd   : > { %v1867_v3 = vcombine.low %v1304_v39, %v1412_v7 }
  0xe1   : > { %2009 = vmatmul.mubr.msk.bf16.vlgmr.msra.gmra.mrb[0].mxu0 %vm549_vm8, %v1865_v57 }
  0xe2   : > { %2017 = vmatpush3.bf16.msra.mxu0 %v1522_v33  ;;  %2012 = vmatprep.mubr.msk.bf16.mxu0 %vm549_vm8, %v1866_v14 }
  0xe3   : > { %1973 = vmatmul.mubr.msk.bf16.gmra.mrb[4].mxu1 %vm549_vm8, %v2492_v21  ;;  %v1513_v21 = vsel %vm2504_vm14, %v1872_v4, %v1512_v9 }
  0xe4   : > { %1982 = vmatprep.mubr.msk.bf16.mxu1 %vm549_vm8, %v1833_v18  ;;  %v1874_v41 = vcombine.low %v1412_v7, %v1513_v21 }
  0xe9   : > { %2013 = vmatmul.mubr.msk.bf16.gmra.mrb[4].mxu0 %vm549_vm8, %v1867_v3 }
  0xea   : > { %2018 = vmatprep.mubr.msk.bf16.mxu0 %vm549_vm8, %v1855_v36 }
  0xef   : > { %1983 = vmatmul.mubr.msk.bf16.vlgmr.msra.gmra.mrb[4].mxu1 %vm549_vm8, %v1834_v28 }
  0xf1   : > { %2019 = vmatmul.mubr.msk.bf16.vlgmr.msra.gmra.mrb[0].mxu0 %vm549_vm8, %v1856_v15 }
  0xf2   : > { %2022 = vmatprep.mubr.msk.bf16.mxu0 %vm549_vm8, %v1857_v24 }
  0xf9   : > { %2023 = vmatmul.mubr.msk.bf16.gmra.mrb[4].mxu0 %vm549_vm8, %v1874_v41 }
 0x1ae   : > { %v1970_v61 = vpop.f32.mrb[0].mxu1 }
 0x1af   : > { %v999_v56 = vpop.f32.mrb[1].mxu1 }
 0x1b0   : > { %v1971_v46 = vpop.f32.mrb[2].mxu1 }
 0x1b1   : > { %v1002_v16 = vpop.f32.mrb[3].mxu1 }
 0x1c2   : > { %v1984_v43 = vpop.f32.mrb[4].mxu1 }
 0x1c3   : > { %v1124_v45 = vpop.f32.mrb[5].mxu1 }
 0x1c4   : > { %v2020_v25 = vpop.f32.mrb[0].mxu0  ;;  %v1985_v47 = vpop.f32.mrb[6].mxu1 }
 0x1c5   : > { %v2028_v31 = vadd.f32 %v2020_v25, %v1970_v61  ;;  %v1558_v22 = vpop.f32.mrb[1].mxu0  ;;  %v1127_v30 = vpop.f32.mrb[7].mxu1 }
 0x1c6   : > { %v2029_v40 = vadd.f32 %v1558_v22, %v999_v56  ;;  %v2021_v51 = vpop.f32.mrb[2].mxu0 }
 0x1c7   : > { %v1599_v52 = vpack.c.bf16 %v2028_v31, %v2028_v31  ;;  %v2030_v49 = vadd.f32 %v2021_v51, %v1971_v46  ;;  %v1561_v53 = vpop.f32.mrb[3].mxu0  ;;  %v1640_v60 = vmul.f32 %v2028_v31, %v2028_v31  ;;  %v1618_v34 = vsel %vm1614_vm0, %v2028_v31, 0.0 }
 0x1c8   : > { %v1597_v54 = vpack.c.bf16 %v2029_v40, %v2029_v40  ;;  %v1638_v58 = vmul.f32 %v2029_v40, %v2029_v40  ;;  %v2031_v59 = vadd.f32 %v1561_v53, %v1002_v16  ;;  %v1615_v0 = vsel %vm1614_vm0, %v2029_v40, 0.0 }
 0x1c9   : > { %1608 = vst.msk [vmem:[%s2596_s19 + $0x8] sm:$0xf] %vm1605_vm15, %v1599_v52  ;;  %v1600_v62 = vpack.c.bf16 %v2030_v49, %v2030_v49  ;;  %v1641_v2 = vmul.f32 %v2030_v49, %v2030_v49  ;;  %v1649_v36 = vsel %vm1614_vm0, %v1640_v60, 0.0  ;;  %v1620_v15 = vsel %vm1614_vm0, %v2030_v49, 0.0 }
 0x1ca   : > { %1606 = vst.msk [vmem:[%s2596_s19] sm:$0xf] %vm1605_vm15, %v1597_v54  ;;  %v1598_v1 = vpack.c.bf16 %v2031_v59, %v2031_v59  ;;  %v1616_v27 = vsel %vm1614_vm0, %v2031_v59, 0.0  ;;  %v1639_v44 = vmul.f32 %v2031_v59, %v2031_v59  ;;  %v1646_v38 = vsel %vm1614_vm0, %v1638_v58, 0.0 }
 0x1cb   : > { %1609 = vst.msk [vmem:[%s2596_s19 + $0xc] sm:$0xf] %vm1605_vm15, %v1600_v62  ;;  %v1617_v5 = vadd.f32 %v1616_v27, %v1615_v0  ;;  %v1651_v42 = vsel %vm1614_vm0, %v1641_v2, 0.0 }
 0x1cc   : > { %1607 = vst.msk [vmem:[%s2596_s19 + $0x4] sm:$0xf] %vm1605_vm15, %v1598_v1  ;;  %v1647_v50 = vsel %vm1614_vm0, %v1639_v44, 0.0  ;;  %v2024_v63 = vpop.f32.mrb[4].mxu0 }
 0x1cd   : > { %v1619_v55 = vadd.f32 %v1618_v34, %v1617_v5  ;;  %v1648_v29 = vadd.f32 %v1647_v50, %v1646_v38  ;;  %v2032_v6 = vadd.f32 %v2024_v63, %v1984_v43  ;;  %v1574_v8 = vpop.f32.mrb[5].mxu0 }
 0x1ce   : > { %v2033_v35 = vadd.f32 %v1574_v8, %v1124_v45  ;;  %v2025_v11 = vpop.f32.mrb[6].mxu0 }
 0x1cf   : > { %v1650_v10 = vadd.f32 %v1649_v36, %v1648_v29  ;;  %v1603_v12 = vpack.c.bf16 %v2032_v6, %v2032_v6  ;;  %v1577_v13 = vpop.f32.mrb[7].mxu0  ;;  %v1621_v20 = vadd.f32 %v1620_v15, %v1619_v55  ;;  %v2034_v32 = vadd.f32 %v2025_v11, %v1985_v47 }
 0x1d0   : > { %v1601_v23 = vpack.c.bf16 %v2033_v35, %v2033_v35  ;;  %v1622_v26 = vsel %vm1614_vm0, %v2033_v35, 0.0  ;;  %v1642_v39 = vmul.f32 %v2033_v35, %v2033_v35  ;;  %v2035_v48 = vadd.f32 %v1577_v13, %v1127_v30 }
 0x1d1   : > { %1612 = vst.msk [vmem:[%s2596_s19 + $0x18] sm:$0xf] %vm1605_vm15, %v1603_v12  ;;  %v1652_v24 = vadd.f32 %v1651_v42, %v1650_v10  ;;  %v1623_v57 = vadd.f32 %v1622_v26, %v1621_v20  ;;  %v1604_v17 = vpack.c.bf16 %v2034_v32, %v2034_v32  ;;  %v1644_v19 = vmul.f32 %v2032_v6, %v2032_v6 }
 0x1d2   : > { %1610 = vst.msk [vmem:[%s2596_s19 + $0x10] sm:$0xf] %vm1605_vm15, %v1601_v23  ;;  %v1653_v33 = vsel %vm1614_vm0, %v1642_v39, 0.0  ;;  %v1602_v18 = vpack.c.bf16 %v2035_v48, %v2035_v48  ;;  %v1624_v7 = vsel %vm1614_vm0, %v2035_v48, 0.0  ;;  %v1643_v3 = vmul.f32 %v2035_v48, %v2035_v48 }
 0x1d3   : > { %v1654_v14 = vadd.f32 %v1653_v33, %v1652_v24  ;;  %1613 = vst.msk [vmem:[%s2596_s19 + $0x1c] sm:$0xf] %vm1605_vm15, %v1604_v17  ;;  %v1625_v28 = vadd.f32 %v1624_v7, %v1623_v57  ;;  %v1626_v37 = vsel %vm1614_vm0, %v2032_v6, 0.0  ;;  %v1645_v4 = vmul.f32 %v2034_v32, %v2034_v32 }
 0x1d4   : > { %1611 = vst.msk [vmem:[%s2596_s19 + $0x14] sm:$0xf] %vm1605_vm15, %v1602_v18  ;;  %v1655_v9 = vsel %vm1614_vm0, %v1643_v3, 0.0  ;;  %v1657_v61 = vsel %vm1614_vm0, %v1644_v19, 0.0  ;;  %v1628_v56 = vsel %vm1614_vm0, %v2034_v32, 0.0 }
 0x1d5   : > { %v1627_v21 = vadd.f32 %v1626_v37, %v1625_v28  ;;  %v1656_v41 = vadd.f32 %v1655_v9, %v1654_v14  ;;  %v1659_v43 = vsel %vm1614_vm0, %v1645_v4, 0.0 }
 0x1d7   : > { %v1629_v46 = vadd.f32 %v1628_v56, %v1627_v21  ;;  %v1658_v16 = vadd.f32 %v1657_v61, %v1656_v41 }
 0x1d9   : > { %v1630_v45 = vrot.slane %v1629_v46, 4  ;;  %v1660_v25 = vadd.f32 %v1659_v43, %v1658_v16 }
 0x1db   : > { %v1631_v47 = vadd.f32 %v1630_v45, %v1629_v46  ;;  %v1661_v31 = vrot.slane %v1660_v25, 4 }
 0x1dd   : > { %v1632_v22 = vrot.slane %v1631_v47, 2  ;;  %v1662_v30 = vadd.f32 %v1661_v31, %v1660_v25 }
 0x1df   : > { %v1633_v40 = vadd.f32 %v1632_v22, %v1631_v47  ;;  %v1663_v51 = vrot.slane %v1662_v30, 2 }
 0x1e1   : > { %v1634_v52 = vrot.slane %v1633_v40, 1  ;;  %v1664_v49 = vadd.f32 %v1663_v51, %v1662_v30 }
 0x1e3   : > { %v1635_v53 = vadd.f32 %v1634_v52, %v1633_v40  ;;  %v1665_v54 = vrot.slane %v1664_v49, 1 }
 0x1e5   : > { %1637 = vst.msk [vmem:[%s211_s22] sm:$0x1] %vm1636_vm1, %v1635_v53  ;;  %v1666_v58 = vadd.f32 %v1665_v54, %v1664_v49 }
 0x1e7   : > { %1667 = vst.msk [vmem:[%s214_s25] sm:$0x1] %vm1636_vm1, %v1666_v58 }
 0x1e8 PF: > { %s15_s15 = sadd.s32 1, %s2147_s15  }
 0x1e9   : > { %p12_p4 = scmp.ge.s32.totalorder %s15_s15, 4  }
 0x1eb   :  { %14 = sbr.rel (!%p12_p4) target bundleno = 1 (0x1), region = 93 }

// kernel: down_forward.4
= control target key start
LH: loop header
LB: loop body
LE: loop exit
PB: predicated region body
PF: predicated region fallthrough
CT: control target
= control target key end

     0   :  { %s2214_s21 = smov 0   ;;  %s2675_s0 = inlined_call_operand.vmem [shape: bf16[2,8,8,8], index: 0, kind: input, shape index: {}]   ;;  %s2676_s1 = inlined_call_operand.vmem [shape: f32[1,1,8], index: 1, kind: input, shape index: {}]   ;;  %s2677_s2 = inlined_call_operand.vmem [shape: f32[1,1,8], index: 2, kind: input, shape index: {}]   ;;  %s2678_s3 = inlined_call_operand.vmem [shape: bf16[9,8,8], index: 3, kind: input, shape index: {}]   ;;  %s2679_s4 = inlined_call_operand.vmem [shape: bf16[2,8,8,8], index: 4, kind: output, shape index: {0}]   ;;  %s2680_s5 = inlined_call_operand.vmem [shape: f32[2,1,8], index: 5, kind: output, shape index: {1}]   ;;  %s2681_s6 = inlined_call_operand.vmem [shape: f32[2,1,8], index: 6, kind: output, shape index: {2}]  }
   0x1 LB: > { %s1813_s22 = sadd.s32 4294967295, %s2176_s21   ;;  %p1817_p0 = scmp.ge.s32.totalorder %s2176_s21, 1  ;;  %s2176_s21 = sphi %s2214_s21, %s17_s21  }
   0x2   : > { %p217_p1 = scmp.lt.s32.totalorder %s2176_s21, 3 }
   0x4   : > { %p218_p2 = pnand %p1817_p0, %p217_p1 }
   0x5   : > { %v1832_v0 = vld [vmem:[%s2678_s3 + $0xc] sm:$0xf] (!%p218_p2)  ;;  %vm605_vm0 = vcmask (!%p218_p2), 1043456   ;;  %p253_p3 = scmp.lt.s32.totalorder (!%p218_p2), %s1813_s22, 1  ;;  %vm324_vm1 = vcmask (!%p218_p2), 60416   ;;  %vm326_vm2 = vcmask (!%p218_p2), 57344  }
   0x6   : > { %221 = sbr.rel (%p218_p2) target bundleno = 377 (0x179), region = 36  ;;  %2145 = vmatprep.subr.msk.bf16.mxu1 (!%p218_p2), %vm605_vm0, %v1832_v0  ;;  %v607_v1 = vsel (!%p218_p2), %vm605_vm0, %v1832_v0, 0  ;;  %v2178_v2 = vmov (!%p218_p2), 0   ;;  %vm332_vm3 = vsmask.f32 (!%p218_p2), 256  ;;  %vm592_vm8 = vcmask (!%p218_p2), 64512  }
   0x7   : > { %1990 = vmatpush3.bf16.msra.mxu1 (!%p218_p2), %v607_v1  ;;  %325 = vst.msk [vmem:[#allocation2] sm:$0xf] (!%p218_p2), %vm324_vm1, %v2178_v2  ;;  %329 = vst.msk [vmem:[#allocation2 + $0x48] sm:$0xf] (!%p218_p2), %vm324_vm1, %v2178_v2  ;;  %v337_v3 = vld [vmem:[#allocation2 + $0x8] sm:$0x1] (!%p218_p2) }
   0x8   : > { %327 = vst.msk [vmem:[#allocation2 + $0x4] sm:$0x1] (!%p218_p2), %vm326_vm2, %v2178_v2  ;;  %330 = vst.msk [vmem:[#allocation2 + $0x4c] sm:$0x1] (!%p218_p2), %vm326_vm2, %v2178_v2  ;;  %v340_v5 = vld [vmem:[#allocation2 + $0x10] sm:$0x1] (!%p218_p2) }
   0x9   : > { %vm2234_vm4 = vmand (!%p218_p2), %vm326_vm2, %vm332_vm3  ;;  %v343_v6 = vld [vmem:[#allocation2 + $0x18] sm:$0x1] (!%p218_p2)  ;;  %v1822_v7 = vld [vmem:[%s2676_s1] ss:$0 sm:$0xff] (!%p218_p2)  ;;  %vm364_vm5 = vsmask.f32 (!%p218_p2), 7938 }
   0xa   : > { %v338_v8 = vsel (!%p218_p2), %vm2234_vm4, 0, %v337_v3  ;;  %v341_v9 = vsel (!%p218_p2), %vm2234_vm4, 0, %v340_v5  ;;  %v344_v10 = vsel (!%p218_p2), %vm2234_vm4, 0, %v343_v6  ;;  %v346_v11 = vld [vmem:[#allocation2 + $0x20] sm:$0x1] (!%p218_p2)  ;;  %vm2300_vm6 = vmand (!%p218_p2), %vm324_vm1, %vm364_vm5  ;;  %vm1313_vm12 = vcmask (!%p218_p2), 1042432  }
   0xb   : > { %339 = vst [vmem:[#allocation2 + $0x8] sm:$0x1] (!%p218_p2), %v338_v8  ;;  %342 = vst [vmem:[#allocation2 + $0x10] sm:$0x1] (!%p218_p2), %v341_v9  ;;  %v347_v12 = vsel (!%p218_p2), %vm2234_vm4, 0, %v346_v11  ;;  %vm1314_vm13 = vcmask (!%p218_p2), 1046532  }
   0xc   : > { %345 = vst [vmem:[#allocation2 + $0x18] sm:$0x1] (!%p218_p2), %v344_v10  ;;  %v2258_v13 = vld [vmem:[%s2678_s3 + $0x10] sm:$0xf] (!%p218_p2)  ;;  %v349_v14 = vld [vmem:[#allocation2 + $0x28] sm:$0x1] (!%p218_p2)  ;;  %vm2310_vm7 = vmand (!%p218_p2), %vm326_vm2, %vm364_vm5 }
   0xd   : > { %s2693_s22 = smov (!%p253_p3, %s1813_s22), 1  ;;  %348 = vst [vmem:[#allocation2 + $0x20] sm:$0x1] %v347_v12  ;;  %2149 = vmatprep.subr.msk.bf16.mxu0 %vm605_vm0, %v2258_v13  ;;  %v2264_v17 = vsel %vm605_vm0, %v2258_v13, 0  ;;  %v350_v19 = vsel %vm2234_vm4, 0, %v349_v14  ;;  %vm2534_vm14 = vmor %vm1313_vm12, %vm1314_vm13 }
   0xe   : > { %s1915_s25 = sshll.u32 %s2693_s22, 5  ;;  %2030 = vmatpush3.bf16.msra.mxu0 %v2264_v17  ;;  %351 = vst [vmem:[#allocation2 + $0x28] sm:$0x1] %v350_v19  ;;  %v352_v24 = vld [vmem:[#allocation2 + $0x30] sm:$0x1]  ;;  %s265_s8 = scalar_lea.vmem %s2680_s5, %s2693_s22 }
   0xf   : > { %s257_s30 = scalar_lea.vmem %s2675_s0, %s1915_s25  ;;  %v1823_v26 = vld [vmem:[%s2677_s2] ss:$0 sm:$0xff]  ;;  %v353_v29 = vsel %vm2234_vm4, 0, %v352_v24  ;;  %v2286_v45 = vld [vmem:[%s2678_s3 + $0x1c] sm:$0xf]  ;;  %s268_s11 = scalar_lea.vmem %s2681_s6, %s2693_s22 }
  0x10   : > { %v1926_v15 = vld [vmem:[%s257_s30] sm:$0xff]   ;;  %v1941_v16 = vld [vmem:[%s257_s30 + $0x8] sm:$0xff]   ;;  %v1942_v18 = vld [vmem:[%s257_s30 + $0x10] sm:$0xff]   ;;  %354 = vst [vmem:[#allocation2 + $0x30] sm:$0x1] %v353_v29  ;;  %2151 = vmatprep.subr.msk.bf16.mxu0 %vm605_vm0, %v2286_v45 }
  0x11   : > { %v1927_v20 = vunpack.c.l.bf16 %v1926_v15  ;;  %v1928_v21 = vunpack.c.h.bf16 %v1926_v15  ;;  %v1931_v22 = vunpack.c.l.bf16 %v1941_v16  ;;  %v1932_v23 = vunpack.c.h.bf16 %v1941_v16  ;;  %v1943_v25 = vld [vmem:[%s257_s30 + $0x18] sm:$0xff]   ;;  %v2277_v31 = vld [vmem:[%s2678_s3] sm:$0xf]  ;;  %s2628_s30 = scalar_lea.vmem %s2679_s4, %s1915_s25 }
  0x12   : > { %v1935_v27 = vunpack.c.l.bf16 %v1942_v18  ;;  %v1936_v28 = vunpack.c.h.bf16 %v1942_v18  ;;  %v1939_v30 = vunpack.c.l.bf16 %v1943_v25  ;;  %v334_v36 = vld [vmem:[#allocation2] sm:$0x1]  ;;  %2146 = vmatprep.subr.msk.bf16.mxu1 %vm605_vm0, %v2277_v31  ;;  %v1940_v40 = vunpack.c.h.bf16 %v1943_v25  ;;  %v511_v11 = vld [vmem:[#allocation2 + $0x8] sm:$0xf]  ;;  %v355_v14 = vld [vmem:[#allocation2 + $0x38] sm:$0x1] }
  0x13   : > { %v293_v32 = vmul.f32 %v1927_v20, %v1822_v7  ;;  %v294_v33 = vmul.f32 %v1928_v21, %v1822_v7  ;;  %v295_v34 = vmul.f32 %v1931_v22, %v1822_v7  ;;  %v296_v35 = vmul.f32 %v1932_v23, %v1822_v7  ;;  %v358_v15 = vld [vmem:[#allocation2 + $0x40] sm:$0x1]  ;;  %v517_v20 = vld [vmem:[#allocation2 + $0x10] sm:$0xf]  ;;  %v523_v24 = vld [vmem:[#allocation2 + $0x18] sm:$0xf] }
  0x14   : > { %v335_v37 = vsel %vm2234_vm4, 0, %v334_v36  ;;  %v297_v38 = vmul.f32 %v1935_v27, %v1822_v7  ;;  %v298_v39 = vmul.f32 %v1936_v28, %v1822_v7  ;;  %v299_v48 = vmul.f32 %v1939_v30, %v1822_v7  ;;  %v529_v25 = vld [vmem:[#allocation2 + $0x20] sm:$0xf] }
  0x15   : > { %v308_v41 = vadd.f32 %v1823_v26, %v293_v32  ;;  %v309_v42 = vadd.f32 %v1823_v26, %v294_v33  ;;  %v310_v43 = vadd.f32 %v1823_v26, %v295_v34  ;;  %v311_v44 = vadd.f32 %v1823_v26, %v296_v35  ;;  %336 = vst [vmem:[#allocation2] sm:$0x1] %v335_v37  ;;  %v366_v33 = vld [vmem:[#allocation2 + $0x4] sm:$0x1]  ;;  %v369_v34 = vld [vmem:[#allocation2 + $0xc] sm:$0x1] }
  0x16   : > { %v312_v46 = vadd.f32 %v1823_v26, %v297_v38  ;;  %v313_v47 = vadd.f32 %v1823_v26, %v298_v39  ;;  %v300_v49 = vmul.f32 %v1940_v40, %v1822_v7  ;;  %v314_v62 = vadd.f32 %v1823_v26, %v299_v48  ;;  %v372_v40 = vld [vmem:[#allocation2 + $0x14] sm:$0x1] }
  0x17   : > { %v316_v50 = vmax.f32 %v308_v41, 0.0  ;;  %v317_v51 = vmax.f32 %v309_v42, 0.0  ;;  %v318_v52 = vmax.f32 %v310_v43, 0.0  ;;  %v319_v53 = vmax.f32 %v311_v44, 0.0  ;;  %v375_v41 = vld [vmem:[#allocation2 + $0x1c] sm:$0x1] }
  0x18   : > { %v320_v54 = vmax.f32 %v312_v46, 0.0  ;;  %v321_v55 = vmax.f32 %v313_v47, 0.0  ;;  %v315_v63 = vadd.f32 %v1823_v26, %v300_v49  ;;  %v322_v30 = vmax.f32 %v314_v62, 0.0  ;;  %v535_v44 = vld [vmem:[#allocation2 + $0x28] sm:$0xf] }
  0x19   : > { %v1917_v56 = vpack.c.bf16 %v316_v50, %v316_v50  ;;  %v1918_v57 = vpack.c.bf16 %v317_v51, %v317_v51  ;;  %v1919_v58 = vpack.c.bf16 %v318_v52, %v318_v52  ;;  %v1920_v59 = vpack.c.bf16 %v319_v53, %v319_v53  ;;  %v541_v46 = vld [vmem:[#allocation2 + $0x30] sm:$0xf] }
  0x1a   : > { %v1921_v60 = vpack.c.bf16 %v320_v54, %v320_v54  ;;  %v1922_v61 = vpack.c.bf16 %v321_v55, %v321_v55  ;;  %v323_v32 = vmax.f32 %v315_v63, 0.0  ;;  %v356_v47 = vsel %vm2234_vm4, 0, %v355_v14  ;;  %v378_v55 = vld [vmem:[#allocation2 + $0x24] sm:$0x1] }
  0x1b   : > { %v429_v0 = vshrl.u32 %v1917_v56, 16  ;;  %v432_v1 = vshll.u32 %v1917_v56, 16  ;;  %v437_v2 = vshrl.u32 %v1918_v57, 16  ;;  %v440_v3 = vshll.u32 %v1918_v57, 16  ;;  %357 = vst [vmem:[#allocation2 + $0x38] sm:$0x1] %v356_v47 }
  0x1c   : > { %v445_v5 = vshrl.u32 %v1919_v58, 16  ;;  %v448_v6 = vshll.u32 %v1919_v58, 16  ;;  %v453_v7 = vshrl.u32 %v1920_v59, 16  ;;  %v456_v8 = vshll.u32 %v1920_v59, 16  ;;  %v381_v56 = vld [vmem:[#allocation2 + $0x2c] sm:$0x1] }
  0x1d   : > { %v2290_v9 = vrot.slane %v429_v0, 7  ;;  %v2292_v10 = vrot.slane %v437_v2, 7  ;;  %v461_v12 = vshrl.u32 %v1921_v60, 16  ;;  %v469_v21 = vshrl.u32 %v1922_v61, 16 }
  0x1e   : > { %v2294_v16 = vrot.slane %v445_v5, 7  ;;  %v2296_v18 = vrot.slane %v453_v7, 7  ;;  %v464_v26 = vshll.u32 %v1921_v60, 16  ;;  %v472_v27 = vshll.u32 %v1922_v61, 16 }
  0x1f   : > { %v434_v22 = vor.u32 %v432_v1, %v2290_v9  ;;  %v442_v23 = vor.u32 %v440_v3, %v2292_v10  ;;  %v2318_v38 = vrot.slane %v461_v12, 7  ;;  %v2320_v39 = vrot.slane %v469_v21, 7 }
  0x20   : > { %v450_v28 = vor.u32 %v448_v6, %v2294_v16  ;;  %v458_v29 = vor.u32 %v456_v8, %v2296_v18  ;;  %v359_v48 = vsel %vm2234_vm4, 0, %v358_v15  ;;  %v1923_v51 = vpack.c.bf16 %v322_v30, %v322_v30 }
  0x21   : > { %v512_v36 = vsel %vm2300_vm6, %v434_v22, %v511_v11  ;;  %v518_v37 = vsel %vm2300_vm6, %v442_v23, %v517_v20  ;;  %v466_v49 = vor.u32 %v464_v26, %v2318_v38  ;;  %v474_v50 = vor.u32 %v472_v27, %v2320_v39  ;;  %360 = vst [vmem:[#allocation2 + $0x40] sm:$0x1] %v359_v48 }
  0x22   : > { %513 = vst [vmem:[#allocation2 + $0x8] sm:$0xf] %v512_v36  ;;  %519 = vst [vmem:[#allocation2 + $0x10] sm:$0xf] %v518_v37  ;;  %v524_v42 = vsel %vm2300_vm6, %v450_v28, %v523_v24  ;;  %v530_v43 = vsel %vm2300_vm6, %v458_v29, %v529_v25  ;;  %v1924_v52 = vpack.c.bf16 %v323_v32, %v323_v32  ;;  %v367_v53 = vsel %vm2310_vm7, 0, %v366_v33 }
  0x23   : > { %525 = vst [vmem:[#allocation2 + $0x18] sm:$0xf] %v524_v42  ;;  %531 = vst [vmem:[#allocation2 + $0x20] sm:$0xf] %v530_v43  ;;  %v370_v54 = vsel %vm2310_vm7, 0, %v369_v34  ;;  %v536_v57 = vsel %vm2300_vm6, %v466_v49, %v535_v44  ;;  %v542_v58 = vsel %vm2300_vm6, %v474_v50, %v541_v46  ;;  %v373_v59 = vsel %vm2310_vm7, 0, %v372_v40 }
  0x24   : > { %368 = vst [vmem:[#allocation2 + $0x4] sm:$0x1] %v367_v53  ;;  %371 = vst [vmem:[#allocation2 + $0xc] sm:$0x1] %v370_v54  ;;  %v376_v60 = vsel %vm2310_vm7, 0, %v375_v41  ;;  %v477_v61 = vshrl.u32 %v1923_v51, 16 }
  0x25   : > { %537 = vst [vmem:[#allocation2 + $0x28] sm:$0xf] %v536_v57  ;;  %543 = vst [vmem:[#allocation2 + $0x30] sm:$0xf] %v542_v58  ;;  %v480_v62 = vshll.u32 %v1923_v51, 16  ;;  %v485_v63 = vshrl.u32 %v1924_v52, 16 }
  0x26   : > { %374 = vst [vmem:[#allocation2 + $0x14] sm:$0x1] %v373_v59  ;;  %377 = vst [vmem:[#allocation2 + $0x1c] sm:$0x1] %v376_v60  ;;  %v488_v0 = vshll.u32 %v1924_v52, 16  ;;  %v379_v1 = vsel %vm2310_vm7, 0, %v378_v55 }
  0x27   : > { %v382_v2 = vsel %vm2310_vm7, 0, %v381_v56  ;;  %v2348_v3 = vrot.slane %v477_v61, 7  ;;  %v2350_v5 = vrot.slane %v485_v63, 7  ;;  %380 = vst [vmem:[#allocation2 + $0x24] sm:$0x1] %v379_v1  ;;  %v435_v6 = vrot.slane %v2290_v9, 4 }
  0x28   : > { %383 = vst [vmem:[#allocation2 + $0x2c] sm:$0x1] %v382_v2  ;;  %v443_v11 = vrot.slane %v2292_v10, 4  ;;  %v451_v21 = vrot.slane %v2294_v16, 4  ;;  %v547_v23 = vld [vmem:[#allocation2 + $0x38] sm:$0xf] }
  0x29   : > { %v2353_v7 = vld [vmem:[#allocation2 + $0x8] sm:$0xf]  ;;  %v2355_v8 = vld [vmem:[#allocation2 + $0x10] sm:$0xf]  ;;  %v482_v20 = vor.u32 %v480_v62, %v2348_v3  ;;  %v490_v22 = vor.u32 %v488_v0, %v2350_v5  ;;  %v553_v24 = vld [vmem:[#allocation2 + $0x40] sm:$0xf] }
  0x2a   : > { %v2358_v12 = vld [vmem:[#allocation2 + $0x18] sm:$0xf]  ;;  %v2360_v14 = vld [vmem:[#allocation2 + $0x20] sm:$0xf]  ;;  %v1833_v15 = vcombine.low %v2353_v7, %v2355_v8  ;;  %v459_v10 = vrot.slane %v2296_v18, 4  ;;  %v467_v25 = vrot.slane %v2318_v38, 4 }
  0x2b   : > { %v1834_v9 = vcombine.low %v2358_v12, %v2360_v14  ;;  %v548_v26 = vsel %vm2300_vm6, %v482_v20, %v547_v23  ;;  %v514_v27 = vld [vmem:[#allocation2 + $0xc] sm:$0x1]  ;;  %v554_v29 = vsel %vm2300_vm6, %v490_v22, %v553_v24  ;;  %v846_v36 = vld [vmem:[#allocation2 + $0x8] sm:$0xf]  ;;  %v848_v37 = vld [vmem:[#allocation2 + $0x10] sm:$0xf] }
  0x2c   : > { %1991 = vmatprep.mubr.msk.bf16.mxu1 %vm592_vm8, %v1833_v15  ;;  %v2375_v16 = vld [vmem:[#allocation2 + $0x28] sm:$0xf]  ;;  %v2377_v28 = vld [vmem:[#allocation2 + $0x30] sm:$0xf]  ;;  %549 = vst [vmem:[#allocation2 + $0x38] sm:$0xf] %v548_v26  ;;  %v515_v18 = vsel %vm2234_vm4, %v435_v6, %v514_v27 }
  0x2d   : > { %1992 = vmatmul.mubr.msk.bf16.vlgmr.msra.gmra.mrb[0].mxu1 %vm592_vm8, %v1834_v9  ;;  %v520_v30 = vld [vmem:[#allocation2 + $0x14] sm:$0x1]  ;;  %v1835_v32 = vcombine.low %v2375_v16, %v2377_v28  ;;  %555 = vst [vmem:[#allocation2 + $0x40] sm:$0xf] %v554_v29  ;;  %516 = vst [vmem:[#allocation2 + $0xc] sm:$0x1] %v515_v18 }
  0x2e   : > { %v521_v33 = vsel %vm2234_vm4, %v443_v11, %v520_v30  ;;  %v526_v34 = vld [vmem:[#allocation2 + $0x1c] sm:$0x1]  ;;  %v532_v38 = vld [vmem:[#allocation2 + $0x24] sm:$0x1]  ;;  %v850_v41 = vld [vmem:[#allocation2 + $0x18] sm:$0xf] }
  0x2f   : > { %522 = vst [vmem:[#allocation2 + $0x14] sm:$0x1] %v521_v33  ;;  %v527_v19 = vsel %vm2234_vm4, %v451_v21, %v526_v34  ;;  %v538_v40 = vld [vmem:[#allocation2 + $0x2c] sm:$0x1]  ;;  %v559_v42 = vld [vmem:[#allocation2] sm:$0xf]  ;;  %1995 = vmatprep.mubr.msk.bf16.mxu1 %vm592_vm8, %v1835_v32  ;;  %v533_v43 = vsel %vm2234_vm4, %v459_v10, %v532_v38 }
  0x30   : > { %528 = vst [vmem:[#allocation2 + $0x1c] sm:$0x1] %v527_v19  ;;  %v539_v44 = vsel %vm2234_vm4, %v467_v25, %v538_v40  ;;  %534 = vst [vmem:[#allocation2 + $0x24] sm:$0x1] %v533_v43  ;;  %vm864_vm9 = vsmask.f32 3328  ;;  %v1841_v60 = vcombine.low %v559_v42, %v2353_v7 }
  0x31   : > { %540 = vst [vmem:[#allocation2 + $0x2c] sm:$0x1] %v539_v44  ;;  %v882_v46 = vshrl.u32 %v846_v36, 16  ;;  %v885_v47 = vshll.u32 %v846_v36, 16  ;;  %v896_v48 = vshrl.u32 %v848_v37, 16  ;;  %v899_v50 = vshll.u32 %v848_v37, 16 }
  0x32   : > { %v852_v49 = vld [vmem:[#allocation2 + $0x20] sm:$0xf]  ;;  %v910_v51 = vshrl.u32 %v850_v41, 16  ;;  %v913_v52 = vshll.u32 %v850_v41, 16  ;;  %vm865_vm10 = vsmask.f32 7440 }
  0x33   : > { %v884_v53 = vrot.slane %v882_v46, 4  ;;  %v887_v54 = vrot.slane %v885_v47, 5  ;;  %v898_v55 = vrot.slane %v896_v48, 4  ;;  %v2394_v56 = vld [vmem:[#allocation2 + $0x38] sm:$0xf]  ;;  %v901_v57 = vrot.slane %v899_v50, 5  ;;  %vm2410_vm11 = vmor %vm864_vm9, %vm865_vm10 }
  0x34   : > { %v912_v58 = vrot.slane %v910_v51, 4  ;;  %v915_v59 = vrot.slane %v913_v52, 5  ;;  %v2397_v61 = vld [vmem:[#allocation2 + $0x40] sm:$0xf]  ;;  %v2399_v62 = vld [vmem:[#allocation2 + $0xc] sm:$0x1]  ;;  %v2493_v35 = vcombine.low %v2377_v28, %v2394_v56 }
  0x35   : > { %v888_v63 = vor.u32 %v887_v54, %v884_v53  ;;  %v924_v0 = vshrl.u32 %v852_v49, 16  ;;  %v927_v1 = vshll.u32 %v852_v49, 16  ;;  %v1836_v2 = vcombine.low %v2394_v56, %v2397_v61  ;;  %v854_v11 = vld [vmem:[#allocation2 + $0x28] sm:$0xf]  ;;  %v844_v48 = vld [vmem:[#allocation2] sm:$0xf] }
  0x36   : > { %v2403_v6 = vld [vmem:[#allocation2 + $0x14] sm:$0x1]  ;;  %v891_v15 = vshll.u32 %v2399_v62, 16  ;;  %v902_v20 = vor.u32 %v901_v57, %v898_v55  ;;  %v916_v23 = vor.u32 %v915_v59, %v912_v58  ;;  %v938_v34 = vshrl.u32 %v854_v11, 16  ;;  %v1849_v49 = vld [vmem:[%s2678_s3 + $0x18] sm:$0xf] }
  0x37   : > { %v2406_v21 = vld [vmem:[#allocation2 + $0x1c] sm:$0x1]  ;;  %v889_v9 = vrot.slane %v888_v63, 4  ;;  %v905_v22 = vshll.u32 %v2403_v6, 16  ;;  %v926_v24 = vrot.slane %v924_v0, 4  ;;  %1996 = vmatmul.mubr.msk.bf16.gmra.mrb[4].mxu1 %vm592_vm8, %v1836_v2  ;;  %v929_v30 = vrot.slane %v927_v1, 5 }
  0x38   : > { %v2416_v10 = vld [vmem:[#allocation2 + $0x24] sm:$0x1]  ;;  %v893_v25 = vrot.slane %v891_v15, 5  ;;  %v903_v26 = vrot.slane %v902_v20, 4  ;;  %v917_v29 = vrot.slane %v916_v23, 4  ;;  %v919_v18 = vshll.u32 %v2406_v21, 16  ;;  %2001 = vmatprep.mubr.msk.bf16.mxu1 %vm592_vm8, %v1841_v60 }
  0x39   : > { %v907_v27 = vrot.slane %v905_v22, 5  ;;  %v933_v33 = vshll.u32 %v2416_v10, 16  ;;  %v941_v36 = vshll.u32 %v854_v11, 16  ;;  %v930_v38 = vor.u32 %v929_v30, %v926_v24  ;;  %v2427_v40 = vld [vmem:[#allocation2 + $0x2c] sm:$0x1] }
  0x3a   : > { %v2422_v32 = vsel %vm2410_vm11, %v889_v9, %v893_v25  ;;  %v921_v19 = vrot.slane %v919_v18, 5  ;;  %v940_v42 = vrot.slane %v938_v34, 4  ;;  %v947_v52 = vshll.u32 %v2427_v40, 16  ;;  %v384_v54 = vld [vmem:[#allocation2 + $0x34] sm:$0x1] }
  0x3b   : > { %v908_v37 = vsel %vm2410_vm11, %v903_v26, %v907_v27  ;;  %v935_v41 = vrot.slane %v933_v33, 5  ;;  %v943_v43 = vrot.slane %v941_v36, 5  ;;  %v931_v46 = vrot.slane %v930_v38, 4  ;;  %v387_v55 = vld [vmem:[#allocation2 + $0x3c] sm:$0x1] }
  0x3c   : > { %v922_v44 = vsel %vm2410_vm11, %v917_v29, %v921_v19  ;;  %v1865_v47 = vcombine.low %v2422_v32, %v908_v37  ;;  %v2443_v57 = vcombine.low %v2355_v8, %v2358_v12  ;;  %v693_v59 = vsel %vm605_vm0, %v2277_v31, 0  ;;  %v1887_v60 = vld [vmem:[%s2678_s3 + $0x8] sm:$0xf]  ;;  %v390_v8 = vld [vmem:[#allocation2 + $0x44] sm:$0x1] }
  0x3d   : > { %v936_v50 = vsel %vm2410_vm11, %v931_v46, %v935_v41  ;;  %v944_v51 = vor.u32 %v943_v43, %v940_v42  ;;  %v2438_v53 = vcombine.low %v908_v37, %v922_v44  ;;  %v361_v63 = vld [vmem:[#allocation2 + $0x48] sm:$0x1]  ;;  %v868_v0 = vshrl.u32 %v844_v48, 16  ;;  %2000 = vmatpush3.bf16.msra.mxu1 %v693_v59  ;;  %v393_v12 = vld [vmem:[#allocation2 + $0x4c] sm:$0x1] }
  0x3e   : > { %2031 = vmatprep.mubr.msk.bf16.mxu0 %vm592_vm8, %v1865_v47  ;;  %v1866_v58 = vcombine.low %v922_v44, %v936_v50  ;;  %v1212_v1 = vsel %vm605_vm0, %v2286_v45, 0  ;;  %v2454_v2 = vcombine.low %v2360_v14, %v2375_v16  ;;  %v871_v11 = vshll.u32 %v844_v48, 16  ;;  %2147 = vmatprep.subr.msk.bf16.mxu1 %vm605_vm0, %v1849_v49  ;;  %v856_v45 = vld [vmem:[#allocation2 + $0x30] sm:$0xf]  ;;  %v2468_v14 = vld [vmem:[%s2678_s3 + $0x4] sm:$0xf] }
  0x3f   : > { %v769_v31 = vsel %vm605_vm0, %v1849_v49, 0  ;;  %v385_v15 = vsel %vm2310_vm7, 0, %v384_v54  ;;  %v388_v20 = vsel %vm2310_vm7, 0, %v387_v55  ;;  %v945_v9 = vrot.slane %v944_v51, 4  ;;  %v858_v16 = vld [vmem:[#allocation2 + $0x38] sm:$0xf] }
  0x40   : > { %2032 = vmatmul.mubr.msk.bf16.vlgmr.msra.gmra.mrb[0].mxu0 %vm592_vm8, %v1866_v58  ;;  %v949_v22 = vrot.slane %v947_v52, 5  ;;  %386 = vst [vmem:[#allocation2 + $0x34] sm:$0x1] %v385_v15  ;;  %389 = vst [vmem:[#allocation2 + $0x3c] sm:$0x1] %v388_v20  ;;  %2002 = vmatmul.mubr.msk.bf16.vlgmr.msra.gmra.mrb[0].mxu1 %vm592_vm8, %v2443_v57  ;;  %v362_v23 = vsel %vm2234_vm4, 0, %v361_v63 }
  0x41   : > { %2040 = vmatpush3.bf16.msra.mxu0 %v1212_v1  ;;  %2041 = vmatprep.mubr.msk.bf16.mxu0 %vm592_vm8, %v2438_v53  ;;  %v391_v24 = vsel %vm2310_vm7, 0, %v390_v8  ;;  %v952_v25 = vshrl.u32 %v856_v45, 16  ;;  %v955_v26 = vshll.u32 %v856_v45, 16  ;;  %363 = vst [vmem:[#allocation2 + $0x48] sm:$0x1] %v362_v23  ;;  %v394_v27 = vsel %vm2310_vm7, 0, %v393_v12 }
  0x42   : > { %2152 = vmatprep.subr.msk.bf16.mxu0 %vm605_vm0, %v1887_v60  ;;  %2005 = vmatprep.mubr.msk.bf16.mxu1 %vm592_vm8, %v2454_v2  ;;  %392 = vst [vmem:[#allocation2 + $0x44] sm:$0x1] %v391_v24  ;;  %v475_v29 = vrot.slane %v2320_v39, 4  ;;  %v870_v18 = vrot.slane %v868_v0, 4  ;;  %v873_v30 = vrot.slane %v871_v11, 5  ;;  %v483_v33 = vrot.slane %v2348_v3, 4 }
  0x43   : > { %2010 = vmatpush3.bf16.msra.mxu1 %v769_v31  ;;  %395 = vst [vmem:[#allocation2 + $0x4c] sm:$0x1] %v394_v27  ;;  %v2487_v34 = vsel %vm2410_vm11, %v945_v9, %v949_v22  ;;  %v966_v36 = vshrl.u32 %v858_v16, 16  ;;  %v969_v37 = vshll.u32 %v858_v16, 16  ;;  %v860_v19 = vld [vmem:[#allocation2 + $0x40] sm:$0xf] }
  0x44   : > { %2148 = vmatprep.subr.msk.bf16.mxu1 %vm605_vm0, %v2468_v14  ;;  %v2489_v38 = vld [vmem:[#allocation2 + $0x4] sm:$0x1]  ;;  %v491_v39 = vrot.slane %v2350_v5, 4  ;;  %v954_v42 = vrot.slane %v952_v25, 4  ;;  %v957_v43 = vrot.slane %v955_v26, 5  ;;  %v874_v3 = vor.u32 %v873_v30, %v870_v18 }
  0x45   : > { %v877_v41 = vshll.u32 %v2489_v38, 16  ;;  %v2498_v44 = vcombine.low %v936_v50, %v2487_v34  ;;  %v1082_v48 = vshrl.u32 %v860_v19, 16  ;;  %v1085_v49 = vshll.u32 %v860_v19, 16  ;;  %v1287_v20 = vld [vmem:[#allocation2] sm:$0xe] }
  0x46   : > { %v968_v56 = vrot.slane %v966_v36, 4  ;;  %v971_v5 = vrot.slane %v969_v37, 5  ;;  %v1375_v52 = vsel %vm605_vm0, %v1887_v60, 0  ;;  %v2516_v60 = vld [vmem:[%s2678_s3 + $0x14] sm:$0xf]  ;;  %v875_v0 = vrot.slane %v874_v3, 4 }
  0x47   : > { %v544_v46 = vld [vmem:[#allocation2 + $0x34] sm:$0x1]  ;;  %v550_v47 = vld [vmem:[#allocation2 + $0x3c] sm:$0x1]  ;;  %v879_v1 = vrot.slane %v877_v41, 5  ;;  %v1084_v4 = vrot.slane %v1082_v48, 4  ;;  %v958_v12 = vor.u32 %v957_v43, %v954_v42 }
  0x48   : > { %v545_v51 = vsel %vm2234_vm4, %v475_v29, %v544_v46  ;;  %v551_v28 = vsel %vm2234_vm4, %v483_v33, %v550_v47  ;;  %2006 = vmatmul.mubr.msk.bf16.gmra.mrb[4].mxu1 %vm592_vm8, %v2493_v35  ;;  %v862_v54 = vld [vmem:[#allocation2 + $0x48] sm:$0xf]  ;;  %v1087_v8 = vrot.slane %v1085_v49, 5  ;;  %v972_v11 = vor.u32 %v971_v5, %v968_v56  ;;  %v1290_v42 = vld [vmem:[#allocation2 + $0x18] sm:$0xe] }
  0x49   : > { %546 = vst [vmem:[#allocation2 + $0x34] sm:$0x1] %v545_v51  ;;  %552 = vst [vmem:[#allocation2 + $0x3c] sm:$0x1] %v551_v28  ;;  %v556_v50 = vld [vmem:[#allocation2 + $0x44] sm:$0x1]  ;;  %2011 = vmatprep.mubr.msk.bf16.mxu1 %vm592_vm8, %v2443_v57  ;;  %v880_v27 = vsel %vm2410_vm11, %v875_v0, %v879_v1 }
  0x4a   : > { %v557_v55 = vsel %vm2234_vm4, %v491_v39, %v556_v50  ;;  %v2509_v58 = vld [vmem:[#allocation2 + $0x4c] sm:$0x1]  ;;  %v1191_v59 = vshrl.u32 %v862_v54, 16  ;;  %v1194_v63 = vshll.u32 %v862_v54, 16  ;;  %v1288_v57 = vld [vmem:[#allocation2 + $0x8] sm:$0xe]  ;;  %v1088_v23 = vor.u32 %v1087_v8, %v1084_v4 }
  0x4b   : > { %558 = vst [vmem:[#allocation2 + $0x44] sm:$0x1] %v557_v55  ;;  %v1200_v45 = vshll.u32 %v2509_v58, 16  ;;  %v1318_v9 = vrot.slane %v2489_v38, 5  ;;  %v1322_v22 = vrot.slane %v2399_v62, 5  ;;  %v1879_v24 = vrot.slane %v1287_v20, 9 }
  0x4c   : > { %2042 = vmatmul.mubr.msk.bf16.vlgmr.msra.gmra.mrb[0].mxu0 %vm592_vm8, %v2498_v44  ;;  %v1193_v31 = vrot.slane %v1191_v59, 4  ;;  %v1196_v15 = vrot.slane %v1194_v63, 5  ;;  %v1880_v25 = vrot.slane %v1288_v57, 9  ;;  %v1006_v26 = vsel %vm605_vm0, %v2468_v14, 0  ;;  %v568_v38 = vld [vmem:[#allocation2 + $0x48] sm:$0xf] }
  0x4d   : > { %2050 = vmatpush3.bf16.msra.mxu0 %v1375_v52  ;;  %v959_v30 = vrot.slane %v958_v12, 4  ;;  %v973_v33 = vrot.slane %v972_v11, 4  ;;  %v1202_v14 = vrot.slane %v1200_v45, 5  ;;  %v1289_v39 = vld [vmem:[#allocation2 + $0x10] sm:$0xe]  ;;  %v1089_v46 = vrot.slane %v1088_v23, 4 }
  0x4e   : > { %2153 = vmatprep.subr.msk.bf16.mxu0 %vm605_vm0, %v2516_v60  ;;  %v1197_v16 = vor.u32 %v1196_v15, %v1193_v31  ;;  %v1856_v48 = vcombine.low %v880_v27, %v2422_v32  ;;  %v1323_v49 = vsel %vm2534_vm14, %v1880_v25, %v1322_v22  ;;  %v1291_v51 = vld [vmem:[#allocation2 + $0x20] sm:$0xe]  ;;  %v1292_v32 = vld [vmem:[#allocation2 + $0x28] sm:$0xe]  ;;  %v1881_v52 = vrot.slane %v1289_v39, 9 }
  0x4f   : > { %v1326_v50 = vrot.slane %v2403_v6, 5  ;;  %v1882_v54 = vrot.slane %v1290_v42, 9  ;;  %v1883_v0 = vrot.slane %v1291_v51, 9  ;;  %v1334_v4 = vrot.slane %v2416_v10, 5  ;;  %v1293_v7 = vld [vmem:[#allocation2 + $0x30] sm:$0xe] }
  0x50   : > { %v2529_v29 = vld [vmem:[#allocation2 + $0x34] sm:$0x1]  ;;  %v2531_v18 = vld [vmem:[#allocation2 + $0x3c] sm:$0x1]  ;;  %v1198_v19 = vrot.slane %v1197_v16, 4  ;;  %2012 = vmatmul.mubr.msk.bf16.vlgmr.msra.gmra.mrb[0].mxu1 %vm592_vm8, %v2454_v2  ;;  %v1319_v2 = vsel %vm2534_vm14, %v1879_v24, %v1318_v9  ;;  %v1884_v8 = vrot.slane %v1292_v32, 9 }
  0x51   : > { %v961_v62 = vshll.u32 %v2529_v29, 16  ;;  %v975_v37 = vshll.u32 %v2531_v18, 16  ;;  %2015 = vmatprep.mubr.msk.bf16.mxu1 %vm592_vm8, %v2493_v35  ;;  %2020 = vmatpush3.bf16.msra.mxu1 %v1006_v26  ;;  %v1850_v35 = vcombine.low %v2397_v61, %v568_v38  ;;  %v1330_v61 = vrot.slane %v2406_v21, 5  ;;  %v1294_v11 = vld [vmem:[#allocation2 + $0x38] sm:$0xe] }
  0x52   : > { %v2542_v41 = vld [vmem:[#allocation2 + $0x44] sm:$0x1]  ;;  %2150 = vmatprep.subr.msk.bf16.mxu1 %vm605_vm0, %v2258_v13  ;;  %v1203_v13 = vsel %vm2410_vm11, %v1198_v19, %v1202_v14  ;;  %v1888_v63 = vcombine.low %v1319_v2, %v1323_v49  ;;  %v1338_v12 = vrot.slane %v2427_v40, 5  ;;  %v1327_v6 = vsel %vm2534_vm14, %v1881_v52, %v1326_v50  ;;  %v1907_v16 = vld [vmem:[%s2678_s3 + $0x20] sm:$0xf] }
  0x53   : > { %v963_v43 = vrot.slane %v961_v62, 5  ;;  %v977_v3 = vrot.slane %v975_v37, 5  ;;  %v1091_v47 = vshll.u32 %v2542_v41, 16  ;;  %v1331_v21 = vsel %vm2534_vm14, %v1882_v54, %v1330_v61  ;;  %v1296_v62 = vld [vmem:[#allocation2 + $0x48] sm:$0xe] }
  0x54   : > { %v1335_v10 = vsel %vm2534_vm14, %v1883_v0, %v1334_v4  ;;  %v1339_v40 = vsel %vm2534_vm14, %v1884_v8, %v1338_v12  ;;  %v1889_v31 = vcombine.low %v1327_v6, %v1331_v21  ;;  %v1885_v15 = vrot.slane %v1293_v7, 9 }
  0x55   : > { %v964_v28 = vsel %vm2410_vm11, %v959_v30, %v963_v43  ;;  %v2559_v56 = vsel %vm2410_vm11, %v973_v33, %v977_v3  ;;  %v1093_v5 = vrot.slane %v1091_v47, 5  ;;  %v1890_v20 = vcombine.low %v1335_v10, %v1339_v40 }
  0x56   : > { %v1859_v55 = vcombine.low %v964_v28, %v2559_v56  ;;  %v1342_v57 = vrot.slane %v2529_v29, 5  ;;  %v1886_v45 = vrot.slane %v1294_v11, 9  ;;  %v1346_v9 = vrot.slane %v2531_v18, 5 }
  0x57   : > { %v1094_v59 = vsel %vm2410_vm11, %v1089_v46, %v1093_v5  ;;  %v1476_v22 = vsel %vm605_vm0, %v2516_v60, 0  ;;  %v1867_v24 = vcombine.low %v2487_v34, %v964_v28  ;;  %v1898_v25 = vcombine.low %v1323_v49, %v1327_v6 }
  0x58   : > { %2045 = vmatprep.mubr.msk.bf16.mxu0 %vm592_vm8, %v1859_v55  ;;  %v1874_v1 = vcombine.low %v1094_v59, %v1203_v13  ;;  %2016 = vmatmul.mubr.msk.bf16.gmra.mrb[4].mxu1 %vm592_vm8, %v1850_v35  ;;  %v1343_v23 = vsel %vm2534_vm14, %v1885_v15, %v1342_v57  ;;  %v1347_v60 = vsel %vm2534_vm14, %v1886_v45, %v1346_v9  ;;  %v1454_v18 = vrot.slane %v2542_v41, 5 }
  0x59   : > { %2021 = vmatprep.mubr.msk.bf16.mxu1 %vm592_vm8, %v1856_v48  ;;  %v1899_v26 = vcombine.low %v1331_v21, %v1335_v10  ;;  %v1900_v27 = vcombine.low %v1339_v40, %v1343_v23  ;;  %v1868_v30 = vcombine.low %v2559_v56, %v1094_v59  ;;  %v1906_v37 = vrot.slane %v1296_v62, 9 }
  0x5a   : > { %2046 = vmatmul.mubr.msk.bf16.gmra.mrb[4].mxu0 %vm592_vm8, %v1874_v1  ;;  %v1555_v19 = vrot.slane %v2509_v58, 5 }
  0x5b   : > { %2051 = vmatprep.mubr.msk.bf16.mxu0 %vm592_vm8, %v1888_v63 }
  0x5c   : > { %v1556_v14 = vsel %vm2534_vm14, %v1906_v37, %v1555_v19 }
  0x60   : > { %2022 = vmatmul.mubr.msk.bf16.vlgmr.msra.gmra.mrb[0].mxu1 %vm592_vm8, %v2438_v53  ;;  %v1891_v53 = vcombine.low %v1343_v23, %v1347_v60 }
  0x61   : > { %2025 = vmatprep.mubr.msk.bf16.mxu1 %vm592_vm8, %v2498_v44  ;;  %2080 = vmatpush3.bf16.msra.mxu1 %v2264_v17  ;;  %v1295_v44 = vld [vmem:[#allocation2 + $0x40] sm:$0xe]  ;;  %v1565_v17 = vsel %vm605_vm0, %v1907_v16, 0 }
  0x62   : > { %2052 = vmatmul.mubr.msk.bf16.vlgmr.msra.gmra.mrb[0].mxu0 %vm592_vm8, %v1889_v31  ;;  %v1896_v29 = vrot.slane %v1295_v44, 9 }
  0x63   : > { %2060 = vmatpush3.bf16.msra.mxu0 %v1476_v22  ;;  %2055 = vmatprep.mubr.msk.bf16.mxu0 %vm592_vm8, %v1890_v20 }
  0x64   : > { %2154 = vmatprep.subr.msk.bf16.mxu0 %vm605_vm0, %v1907_v16  ;;  %v1455_v34 = vsel %vm2534_vm14, %v1896_v29, %v1454_v18 }
  0x65   : > { %v1901_v33 = vcombine.low %v1347_v60, %v1455_v34  ;;  %v1908_v38 = vcombine.low %v1455_v34, %v1556_v14 }
  0x68   : > { %2026 = vmatmul.mubr.msk.bf16.gmra.mrb[4].mxu1 %vm592_vm8, %v1859_v55 }
  0x69   : > { %2035 = vmatprep.mubr.msk.bf16.mxu1 %vm592_vm8, %v1867_v24 }
  0x6a   : > { %2056 = vmatmul.mubr.msk.bf16.gmra.mrb[4].mxu0 %vm592_vm8, %v1891_v53 }
  0x6b   : > { %2061 = vmatprep.mubr.msk.bf16.mxu0 %vm592_vm8, %v1898_v25 }
  0x72   : > { %2062 = vmatmul.mubr.msk.bf16.vlgmr.msra.gmra.mrb[0].mxu0 %vm592_vm8, %v1899_v26 }
  0x73   : > { %2070 = vmatpush3.bf16.msra.mxu0 %v1565_v17  ;;  %2065 = vmatprep.mubr.msk.bf16.mxu0 %vm592_vm8, %v1900_v27 }
  0x74   : > { %2036 = vmatmul.mubr.msk.bf16.vlgmr.msra.gmra.mrb[4].mxu1 %vm592_vm8, %v1868_v30 }
  0x7a   : > { %2066 = vmatmul.mubr.msk.bf16.gmra.mrb[4].mxu0 %vm592_vm8, %v1901_v33 }
  0x7b   : > { %2071 = vmatprep.mubr.msk.bf16.mxu0 %vm592_vm8, %v1889_v31 }
  0x82   : > { %2072 = vmatmul.mubr.msk.bf16.vlgmr.msra.gmra.mrb[0].mxu0 %vm592_vm8, %v1890_v20 }
  0x83   : > { %2075 = vmatprep.mubr.msk.bf16.mxu0 %vm592_vm8, %v1891_v53 }
  0x8a   : > { %2076 = vmatmul.mubr.msk.bf16.gmra.mrb[4].mxu0 %vm592_vm8, %v1908_v38 }
 0x133   : > { %v2023_v39 = vpop.f32.mrb[0].mxu1 }
 0x134   : > { %v1042_v41 = vpop.f32.mrb[1].mxu1 }
 0x135   : > { %v2024_v42 = vpop.f32.mrb[2].mxu1 }
 0x136   : > { %v1045_v43 = vpop.f32.mrb[3].mxu1 }
 0x147   : > { %v2037_v3 = vpop.f32.mrb[4].mxu1 }
 0x148   : > { %v1167_v46 = vpop.f32.mrb[5].mxu1 }
 0x149   : > { %v2038_v47 = vpop.f32.mrb[6].mxu1 }
 0x14a   : > { %v1170_v48 = vpop.f32.mrb[7].mxu1 }
 0x155   : > { %v2073_v58 = vpop.f32.mrb[0].mxu0 }
 0x156   : > { %v2081_v2 = vadd.f32 %v2073_v58, %v2023_v39  ;;  %v1601_v49 = vpop.f32.mrb[1].mxu0 }
 0x157   : > { %v2082_v36 = vadd.f32 %v1601_v49, %v1042_v41  ;;  %v2074_v35 = vpop.f32.mrb[2].mxu0 }
 0x158   : > { %v1642_v51 = vpack.c.bf16 %v2081_v2, %v2081_v2  ;;  %v2083_v28 = vadd.f32 %v2074_v35, %v2024_v42  ;;  %v1604_v56 = vpop.f32.mrb[3].mxu0  ;;  %v1680_v52 = vmul.f32 %v2081_v2, %v2081_v2  ;;  %v1659_v1 = vsel %vm592_vm8, %v2081_v2, 0.0 }
 0x159   : > { %v1640_v5 = vpack.c.bf16 %v2082_v36, %v2082_v36  ;;  %v1678_v13 = vmul.f32 %v2082_v36, %v2082_v36  ;;  %v2084_v32 = vadd.f32 %v1604_v56, %v1045_v43  ;;  %v1656_v54 = vsel %vm592_vm8, %v2082_v36, 0.0 }
 0x15a   : > { %1650 = vst.msk [vmem:[%s2628_s30 + $0x8] sm:$0xf] %vm324_vm1, %v1642_v51  ;;  %v1643_v50 = vpack.c.bf16 %v2083_v28, %v2083_v28  ;;  %v1681_v63 = vmul.f32 %v2083_v28, %v2083_v28  ;;  %v1689_v40 = vsel %vm592_vm8, %v1680_v52, 0.0  ;;  %v1661_v15 = vsel %vm592_vm8, %v2083_v28, 0.0 }
 0x15b   : > { %1648 = vst.msk [vmem:[%s2628_s30] sm:$0xf] %vm324_vm1, %v1640_v5  ;;  %v1641_v55 = vpack.c.bf16 %v2084_v32, %v2084_v32  ;;  %v1657_v61 = vsel %vm592_vm8, %v2084_v32, 0.0  ;;  %v1679_v59 = vmul.f32 %v2084_v32, %v2084_v32  ;;  %v1686_v4 = vsel %vm592_vm8, %v1678_v13, 0.0 }
 0x15c   : > { %1651 = vst.msk [vmem:[%s2628_s30 + $0xc] sm:$0xf] %vm324_vm1, %v1643_v50  ;;  %v1658_v0 = vadd.f32 %v1657_v61, %v1656_v54  ;;  %v1691_v20 = vsel %vm592_vm8, %v1681_v63, 0.0 }
 0x15d   : > { %1649 = vst.msk [vmem:[%s2628_s30 + $0x4] sm:$0xf] %vm324_vm1, %v1641_v55  ;;  %v1687_v8 = vsel %vm592_vm8, %v1679_v59, 0.0  ;;  %v2077_v12 = vpop.f32.mrb[4].mxu0 }
 0x15e   : > { %v1660_v6 = vadd.f32 %v1659_v1, %v1658_v0  ;;  %v1688_v21 = vadd.f32 %v1687_v8, %v1686_v4  ;;  %v2085_v7 = vadd.f32 %v2077_v12, %v2037_v3  ;;  %v1617_v10 = vpop.f32.mrb[5].mxu0 }
 0x15f   : > { %v2086_v11 = vadd.f32 %v1617_v10, %v1167_v46  ;;  %v2078_v31 = vpop.f32.mrb[6].mxu0 }
 0x160   : > { %v1690_v57 = vadd.f32 %v1689_v40, %v1688_v21  ;;  %v1646_v45 = vpack.c.bf16 %v2085_v7, %v2085_v7  ;;  %v1620_v9 = vpop.f32.mrb[7].mxu0  ;;  %v1662_v16 = vadd.f32 %v1661_v15, %v1660_v6  ;;  %v2087_v24 = vadd.f32 %v2078_v31, %v2038_v47 }
 0x161   : > { %v1644_v22 = vpack.c.bf16 %v2086_v11, %v2086_v11  ;;  %v1663_v23 = vsel %vm592_vm8, %v2086_v11, 0.0  ;;  %v1682_v60 = vmul.f32 %v2086_v11, %v2086_v11  ;;  %v2088_v25 = vadd.f32 %v1620_v9, %v1170_v48 }
 0x162   : > { %1654 = vst.msk [vmem:[%s2628_s30 + $0x18] sm:$0xf] %vm324_vm1, %v1646_v45  ;;  %v1692_v53 = vadd.f32 %v1691_v20, %v1690_v57  ;;  %v1664_v44 = vadd.f32 %v1663_v23, %v1662_v16  ;;  %v1647_v29 = vpack.c.bf16 %v2087_v24, %v2087_v24  ;;  %v1684_v18 = vmul.f32 %v2085_v7, %v2085_v7 }
 0x163   : > { %1652 = vst.msk [vmem:[%s2628_s30 + $0x10] sm:$0xf] %vm324_vm1, %v1644_v22  ;;  %v1693_v26 = vsel %vm592_vm8, %v1682_v60, 0.0  ;;  %v1645_v17 = vpack.c.bf16 %v2088_v25, %v2088_v25  ;;  %v1665_v30 = vsel %vm592_vm8, %v2088_v25, 0.0  ;;  %v1683_v34 = vmul.f32 %v2088_v25, %v2088_v25 }
 0x164   : > { %v1694_v27 = vadd.f32 %v1693_v26, %v1692_v53  ;;  %1655 = vst.msk [vmem:[%s2628_s30 + $0x1c] sm:$0xf] %vm324_vm1, %v1647_v29  ;;  %v1666_v33 = vadd.f32 %v1665_v30, %v1664_v44  ;;  %v1667_v62 = vsel %vm592_vm8, %v2085_v7, 0.0  ;;  %v1685_v37 = vmul.f32 %v2087_v24, %v2087_v24 }
 0x165   : > { %1653 = vst.msk [vmem:[%s2628_s30 + $0x14] sm:$0xf] %vm324_vm1, %v1645_v17  ;;  %v1695_v19 = vsel %vm592_vm8, %v1683_v34, 0.0  ;;  %v1697_v39 = vsel %vm592_vm8, %v1684_v18, 0.0  ;;  %v1669_v41 = vsel %vm592_vm8, %v2087_v24, 0.0 }
 0x166   : > { %v1668_v14 = vadd.f32 %v1667_v62, %v1666_v33  ;;  %v1696_v38 = vadd.f32 %v1695_v19, %v1694_v27  ;;  %v1699_v3 = vsel %vm592_vm8, %v1685_v37, 0.0 }
 0x168   : > { %v1670_v42 = vadd.f32 %v1669_v41, %v1668_v14  ;;  %v1698_v43 = vadd.f32 %v1697_v39, %v1696_v38 }
 0x16a   : > { %v1671_v46 = vrot.slane %v1670_v42, 4  ;;  %v1700_v47 = vadd.f32 %v1699_v3, %v1698_v43 }
 0x16c   : > { %v1672_v48 = vadd.f32 %v1671_v46, %v1670_v42  ;;  %v1701_v58 = vrot.slane %v1700_v47, 4 }
 0x16e   : > { %v1673_v2 = vrot.slane %v1672_v48, 2  ;;  %v1702_v49 = vadd.f32 %v1701_v58, %v1700_v47 }
 0x170   : > { %v1674_v36 = vadd.f32 %v1673_v2, %v1672_v48  ;;  %v1703_v35 = vrot.slane %v1702_v49, 2 }
 0x172   : > { %v1675_v51 = vrot.slane %v1674_v36, 1  ;;  %v1704_v28 = vadd.f32 %v1703_v35, %v1702_v49 }
 0x174   : > { %v1676_v56 = vadd.f32 %v1675_v51, %v1674_v36  ;;  %v1705_v5 = vrot.slane %v1704_v28, 1 }
 0x176   : > { %1677 = vst.msk [vmem:[%s265_s8] sm:$0x1] %vm326_vm2, %v1676_v56  ;;  %v1706_v13 = vadd.f32 %v1705_v5, %v1704_v28 }
 0x178   : > { %1707 = vst.msk [vmem:[%s268_s11] sm:$0x1] %vm326_vm2, %v1706_v13 }
 0x179 PF: > { %s17_s21 = sadd.s32 1, %s2176_s21  }
 0x17a   : > { %p14_p4 = scmp.ge.s32.totalorder %s17_s21, 4  }
 0x17c   :  { %16 = sbr.rel (!%p14_p4) target bundleno = 1 (0x1), region = 100 }

</bundles_post_ra>
